<compile_context>
chip_gen: v7x
topology: tpu7x:2x2x1
jax: 0.10.0
libtpu: 0.0.40
codegen_flags: <defaults>
</compile_context>

<pallas_src>
import functools
import math

import jax
import jax.numpy as jnp
from jax.experimental import pallas as pl
from jax.experimental.pallas import tpu as pltpu

F32 = jnp.float32


# ----------------------------------------------------------------------------
# fused VQ kernel: one (C, Lt) tile of positions per grid step
# ----------------------------------------------------------------------------
def _vq_kernel(x_ref, cb_ref, cbt_ref, cbsq_ref, qe_ref, idx_ref, sse_ref,
               *, valid_l, lane_tile, need_mask):
    x = x_ref[0].astype(jnp.float32)                  # (C, Lt)
    cb = cb_ref[...]                                  # (K, C)
    cbt = cbt_ref[...]                                # (C, K)
    cbsq = cbsq_ref[...]                              # (K, 1) precomputed ||c_k||^2
    K = cb.shape[0]

    # distances up to a per-position constant: dist[k, l] = ||c_k||^2 - 2 c_k.x_l
    scores = jnp.dot(cb, x, preferred_element_type=jnp.float32)   # (K, Lt)  MXU
    dist = cbsq - 2.0 * scores                                    # (K, Lt)

    # first-index argmin over k (sublane axis), int32 throughout
    min_val = jnp.min(dist, axis=0, keepdims=True)                # (1, Lt)
    k_iota = jax.lax.broadcasted_iota(jnp.int32, dist.shape, 0)   # (K, Lt)
    idx = jnp.min(jnp.where(dist == min_val, k_iota, K),
                  axis=0, keepdims=True)                          # (1, Lt) i32
    idx_ref[...] = idx[None]                                      # lane-dense store

    # codebook "gather" as a one-hot matmul on the MXU (no dynamic gather);
    # (k_iota == idx) stays exactly one-hot under distance ties.
    one_hot = (k_iota == idx).astype(jnp.float32)                 # (K, Lt)
    qe = jnp.dot(cbt, one_hot, preferred_element_type=jnp.float32)  # (C, Lt)
    qe_ref[...] = qe[None].astype(qe_ref.dtype)

    # partial sum of squared error for the commitment loss
    d = x - qe
    sq = d * d
    if need_mask:  # static: only compiled when L was padded up to a 128 multiple
        lane = jax.lax.broadcasted_iota(jnp.int32, sq.shape, 1)
        valid = (pl.program_id(1) * lane_tile + lane) < valid_l
        sq = jnp.where(valid, sq, 0.0)
    sse_ref[...] = jnp.full(sse_ref.shape, jnp.sum(sq), dtype=jnp.float32)


def _pick_lane_tile(n128, cap=8):
    """Largest divisor of n128 that is <= cap (tile = 128 * divisor)."""
    for t in range(min(n128, cap), 0, -1):
        if n128 % t == 0:
            return t
    return 1


# ----------------------------------------------------------------------------
# VQModule.forward : (quantized, commit_loss, indices)
# ----------------------------------------------------------------------------
def vq_module_forward(x, codebook, dim=-1):
    nd = x.ndim
    dim = dim % nd
    C = x.shape[dim]
    K, cb_c = codebook.shape
    assert cb_c == C, "codebook embedding size must match the channel dim"

    lead = x.shape[:dim]
    trail = x.shape[dim + 1:]
    B = math.prod(lead) if lead else 1
    L = math.prod(trail) if trail else 1

    channel_last = (dim == nd - 1)
    if channel_last:
        # TODO(synk): channel-last inputs need one transpose to put positions on
        # the lane axis; the common NCHW (dim=1) case below is a free reshape.
        M = B
        x3 = x.reshape(M, C).T.reshape(1, C, M)
        Bq, Lq = 1, M
    else:
        x3 = x.reshape(B, C, L)          # free reshape: channels already on rows
        Bq, Lq = B, L

    # pad the position axis up to a multiple of 128 (lane-dense tiles)
    Lp = ((Lq + 127) // 128) * 128
    if Lp != Lq:
        x3 = jnp.pad(x3, ((0, 0), (0, 0), (0, Lp - Lq)))

    Lt = 128 * _pick_lane_tile(Lp // 128)             # bounded lane tile (<=1024)
    n_l = Lp // Lt
    grid = (Bq, n_l)

    cb = codebook.astype(F32)                         # (K, C)
    cbt = cb.T                                        # (C, K)
    cbsq = jnp.sum(cb * cb, axis=1, keepdims=True)    # (K, 1) precomputed norms

    kernel = functools.partial(_vq_kernel, valid_l=Lq, lane_tile=Lt,
                               need_mask=(Lp != Lq))

    qe_out, idx_out, sse_out = pl.pallas_call(
        kernel,
        grid=grid,
        in_specs=[
            pl.BlockSpec((1, C, Lt), lambda b, j: (b, 0, j)),   # x tile (native dtype)
            pl.BlockSpec((K, C), lambda b, j: (0, 0)),          # codebook   (resident)
            pl.BlockSpec((C, K), lambda b, j: (0, 0)),          # codebook^T (resident)
            pl.BlockSpec((K, 1), lambda b, j: (0, 0)),          # ||c_k||^2  (resident)
        ],
        out_specs=(
            pl.BlockSpec((1, C, Lt), lambda b, j: (b, 0, j)),       # quantized
            pl.BlockSpec((1, 1, Lt), lambda b, j: (b, 0, j)),       # indices
            pl.BlockSpec((1, 1, 1, 128), lambda b, j: (b, j, 0, 0)),  # partial SSE
        ),
        out_shape=(
            jax.ShapeDtypeStruct((Bq, C, Lp), x.dtype),
            jax.ShapeDtypeStruct((Bq, 1, Lp), jnp.int32),
            jax.ShapeDtypeStruct((Bq, n_l, 1, 128), F32),
        ),
        compiler_params=pltpu.CompilerParams(
            dimension_semantics=("parallel", "parallel")),
    )(x3, cb, cbt, cbsq)

    qe3 = qe_out[:, :, :Lq]                           # drop lane padding (no-op here)
    idx2 = idx_out[:, 0, :Lq]

    if channel_last:
        qe = qe3[0].T.reshape(x.shape)
        indices = idx2.reshape(lead)
    else:
        qe = qe3.reshape(x.shape)                     # already in original layout
        indices = idx2.reshape(lead + trail)

    commit_loss = jnp.sum(sse_out[:, :, 0, 0]) / jnp.float32(Bq * Lq * C)

    # TODO(synk): training-time EMA codebook update / q_step_counter increment
    # are stateful buffers and not part of the eval forward pass.
    return qe, commit_loss, indices


# ----------------------------------------------------------------------------
if __name__ == "__main__":
    c_hidden, k = 32, 256                             # VQModule(c_hidden, k)

    key = jax.random.PRNGKey(0)
    kx, kc = jax.random.split(key)
    x = jax.random.normal(kx, (2, c_hidden, 16, 16), dtype=F32)     # NCHW latent
    codebook = jax.random.uniform(kc, (k, c_hidden), dtype=F32,
                                  minval=-1.0 / k, maxval=1.0 / k)  # Embedding init

    fwd = jax.jit(functools.partial(vq_module_forward, dim=1))
    qe, commit_loss, indices = fwd(x, codebook)
    jax.block_until_ready((qe, commit_loss, indices))

    # plain-XLA reference cross-check (loose: near-ties may resolve differently)
    xm = jnp.moveaxis(x, 1, -1).reshape(-1, c_hidden)
    dist = jnp.sum(codebook * codebook, axis=1)[None, :] - 2.0 * xm @ codebook.T
    idx_ref = jnp.argmin(dist, axis=1)
    qe_ref = codebook[idx_ref]
    cl_ref = jnp.mean((xm - qe_ref) ** 2)

    assert qe.shape == x.shape and qe.dtype == x.dtype
    assert commit_loss.shape == () and bool(jnp.isfinite(commit_loss))
    assert indices.shape == (2, 16, 16) and indices.dtype == jnp.int32
    # quantized values must be exactly the selected codebook rows
    qe_rows = jnp.moveaxis(qe, 1, -1).reshape(-1, c_hidden)
    assert bool(jnp.allclose(qe_rows, codebook[indices.reshape(-1)], atol=1e-6))
    assert abs(float(commit_loss) - float(cl_ref)) < 1e-3 * max(1.0, float(cl_ref))
    assert float(jnp.mean((indices.reshape(-1) == idx_ref).astype(F32))) > 0.99
    print("KERNEL_OK")
</pallas_src>

<mosaic_0001>
module attributes {stable_mosaic.version = 11 : i64} {
  func.func @_vq_kernel(%arg0: i32, %arg1: i32, %arg2: memref<1x32x256xf32, #tpu.memory_space<vmem>>, %arg3: memref<256x32xf32, #tpu.memory_space<vmem>>, %arg4: memref<32x256xf32, #tpu.memory_space<vmem>>, %arg5: memref<256x1xf32, #tpu.memory_space<vmem>>, %arg6: memref<1x32x256xf32, #tpu.memory_space<vmem>>, %arg7: memref<1x1x256xi32, #tpu.memory_space<vmem>>, %arg8: memref<1x1x1x128xf32, #tpu.memory_space<vmem>>) attributes {dimension_semantics = [#tpu.dimension_semantics<parallel>, #tpu.dimension_semantics<parallel>], iteration_bounds = array<i64: 2, 1>, scalar_prefetch = 0 : i64, scratch_operands = 0 : i64, tpu.core_type = #tpu.core_type<tc>, window_params = [{transform_indices = @transform_0, window_bounds = array<i64: 1, 32, 256>}, {pipeline_mode = #tpu.pipeline_mode<synchronous>, transform_indices = @transform_1, window_bounds = array<i64: 256, 32>}, {pipeline_mode = #tpu.pipeline_mode<synchronous>, transform_indices = @transform_2, window_bounds = array<i64: 32, 256>}, {pipeline_mode = #tpu.pipeline_mode<synchronous>, transform_indices = @transform_3, window_bounds = array<i64: 256, 1>}, {transform_indices = @transform_4, window_bounds = array<i64: 1, 32, 256>}, {transform_indices = @transform_5, window_bounds = array<i64: 1, 1, 256>}, {transform_indices = @transform_6, window_bounds = array<i64: 1, 1, 1, 128>}]} {
    %c0 = arith.constant 0 : index
    %c0_0 = arith.constant 0 : index
    %c0_1 = arith.constant 0 : index
    %0 = vector.load %arg2[%c0, %c0_0, %c0_1] : memref<1x32x256xf32, #tpu.memory_space<vmem>>, vector<1x32x256xf32>
    %1 = vector.shape_cast %0 : vector<1x32x256xf32> to vector<32x256xf32>
    %c0_2 = arith.constant 0 : index
    %c0_3 = arith.constant 0 : index
    %2 = vector.load %arg3[%c0_2, %c0_3] : memref<256x32xf32, #tpu.memory_space<vmem>>, vector<256x32xf32>
    %c0_4 = arith.constant 0 : index
    %c0_5 = arith.constant 0 : index
    %3 = vector.load %arg4[%c0_4, %c0_5] : memref<32x256xf32, #tpu.memory_space<vmem>>, vector<32x256xf32>
    %c0_6 = arith.constant 0 : index
    %c0_7 = arith.constant 0 : index
    %4 = vector.load %arg5[%c0_6, %c0_7] : memref<256x1xf32, #tpu.memory_space<vmem>>, vector<256x1xf32>
    %cst = arith.constant dense<0.000000e+00> : vector<256x256xf32>
    %5 = tpu.matmul %2, %1, %cst {dimension_numbers = #tpu.dot_dimension_numbers<[1], [0], [0], [1], [0, 0, 1, 1], [], []>} : vector<256x32xf32>, vector<32x256xf32>, vector<256x256xf32> -> vector<256x256xf32>
    %cst_8 = arith.constant 2.000000e+00 : f32
    %6 = vector.broadcast %cst_8 : f32 to vector<256x256xf32>
    %7 = arith.mulf %6, %5 : vector<256x256xf32>
    %8 = vector.broadcast %4 : vector<256x1xf32> to vector<256x256xf32>
    %9 = arith.subf %8, %7 : vector<256x256xf32>
    %cst_9 = arith.constant dense<0x7F800000> : vector<256xf32>
    %10 = vector.multi_reduction <minimumf>, %9, %cst_9 [0] : vector<256x256xf32> to vector<256xf32>
    %11 = vector.shape_cast %10 : vector<256xf32> to vector<1x256xf32>
    %12 = tpu.iota {dimensions = array<i32: 0>} : vector<256x256xi32>
    %13 = vector.broadcast %11 : vector<1x256xf32> to vector<256x256xf32>
    %14 = arith.cmpf oeq, %9, %13 : vector<256x256xf32>
    %c256_i32 = arith.constant 256 : i32
    %15 = vector.broadcast %c256_i32 : i32 to vector<256x256xi32>
    %16 = arith.select %14, %12, %15 : vector<256x256xi1>, vector<256x256xi32>
    %cst_10 = arith.constant dense<2147483647> : vector<256xi32>
    %17 = vector.multi_reduction <minsi>, %16, %cst_10 [0] : vector<256x256xi32> to vector<256xi32>
    %18 = vector.shape_cast %17 : vector<256xi32> to vector<1x256xi32>
    %19 = vector.shape_cast %18 : vector<1x256xi32> to vector<1x1x256xi32>
    %c0_11 = arith.constant 0 : index
    %c0_12 = arith.constant 0 : index
    %c0_13 = arith.constant 0 : index
    %20 = vector.load %arg7[%c0_11, %c0_12, %c0_13] : memref<1x1x256xi32, #tpu.memory_space<vmem>>, vector<1x1x256xi32>
    tpu.vector_store %arg7[%c0_11, %c0_12, %c0_13], %19 {strides = array<i32>} : memref<1x1x256xi32, #tpu.memory_space<vmem>>, vector<1x1x256xi32>,
    %21 = vector.broadcast %18 : vector<1x256xi32> to vector<256x256xi32>
    %22 = arith.cmpi eq, %12, %21 : vector<256x256xi32>
    %23 = arith.extui %22 : vector<256x256xi1> to vector<256x256xi32>
    %24 = arith.sitofp %23 : vector<256x256xi32> to vector<256x256xf32>
    %cst_14 = arith.constant dense<0.000000e+00> : vector<32x256xf32>
    %25 = tpu.matmul %3, %24, %cst_14 {dimension_numbers = #tpu.dot_dimension_numbers<[1], [0], [0], [1], [0, 0, 1, 1], [], []>} : vector<32x256xf32>, vector<256x256xf32>, vector<32x256xf32> -> vector<32x256xf32>
    %26 = vector.shape_cast %25 : vector<32x256xf32> to vector<1x32x256xf32>
    %c0_15 = arith.constant 0 : index
    %c0_16 = arith.constant 0 : index
    %c0_17 = arith.constant 0 : index
    %27 = vector.load %arg6[%c0_15, %c0_16, %c0_17] : memref<1x32x256xf32, #tpu.memory_space<vmem>>, vector<1x32x256xf32>
    tpu.vector_store %arg6[%c0_15, %c0_16, %c0_17], %26 {strides = array<i32>} : memref<1x32x256xf32, #tpu.memory_space<vmem>>, vector<1x32x256xf32>,
    %28 = arith.subf %1, %25 : vector<32x256xf32>
    %29 = arith.mulf %28, %28 : vector<32x256xf32>
    %30 = vector.shape_cast %29 : vector<32x256xf32> to vector<1x32x256xf32>
    %cst_18 = arith.constant dense<0.000000e+00> : vector<1xf32>
    %31 = vector.multi_reduction <add>, %30, %cst_18 [1, 2] : vector<1x32x256xf32> to vector<1xf32>
    %32 = vector.shape_cast %31 : vector<1xf32> to vector<1x1x1xf32>
    %33 = vector.extract %32[0, 0, 0] : f32 from vector<1x1x1xf32>
    %34 = vector.broadcast %33 : f32 to vector<1x1x1x128xf32>
    %c0_19 = arith.constant 0 : index
    %c0_20 = arith.constant 0 : index
    %c0_21 = arith.constant 0 : index
    %c0_22 = arith.constant 0 : index
    %35 = vector.load %arg8[%c0_19, %c0_20, %c0_21, %c0_22] : memref<1x1x1x128xf32, #tpu.memory_space<vmem>>, vector<1x1x1x128xf32>
    tpu.vector_store %arg8[%c0_19, %c0_20, %c0_21, %c0_22], %34 {strides = array<i32>} : memref<1x1x1x128xf32, #tpu.memory_space<vmem>>, vector<1x1x1x128xf32>,
    return
  }
  func.func @transform_0(%arg0: i32, %arg1: i32) -> (i32, i32, i32) {
    %c0_i32 = arith.constant 0 : i32
    %c0_i32_0 = arith.constant 0 : i32
    return %arg0, %c0_i32, %arg1 : i32, i32, i32
  }
  func.func @transform_1(%arg0: i32, %arg1: i32) -> (i32, i32) {
    %c0_i32 = arith.constant 0 : i32
    %c0_i32_0 = arith.constant 0 : i32
    %c0_i32_1 = arith.constant 0 : i32
    return %c0_i32, %c0_i32_0 : i32, i32
  }
  func.func @transform_2(%arg0: i32, %arg1: i32) -> (i32, i32) {
    %c0_i32 = arith.constant 0 : i32
    %c0_i32_0 = arith.constant 0 : i32
    %c0_i32_1 = arith.constant 0 : i32
    return %c0_i32, %c0_i32_0 : i32, i32
  }
  func.func @transform_3(%arg0: i32, %arg1: i32) -> (i32, i32) {
    %c0_i32 = arith.constant 0 : i32
    %c0_i32_0 = arith.constant 0 : i32
    %c0_i32_1 = arith.constant 0 : i32
    return %c0_i32, %c0_i32_0 : i32, i32
  }
  func.func @transform_4(%arg0: i32, %arg1: i32) -> (i32, i32, i32) {
    %c0_i32 = arith.constant 0 : i32
    %c0_i32_0 = arith.constant 0 : i32
    return %arg0, %c0_i32, %arg1 : i32, i32, i32
  }
  func.func @transform_5(%arg0: i32, %arg1: i32) -> (i32, i32, i32) {
    %c0_i32 = arith.constant 0 : i32
    %c0_i32_0 = arith.constant 0 : i32
    return %arg0, %c0_i32, %arg1 : i32, i32, i32
  }
  func.func @transform_6(%arg0: i32, %arg1: i32) -> (i32, i32, i32, i32) {
    %c0_i32 = arith.constant 0 : i32
    %c0_i32_0 = arith.constant 0 : i32
    %c0_i32_1 = arith.constant 0 : i32
    return %arg0, %arg1, %c0_i32, %c0_i32_0 : i32, i32, i32, i32
  }
}

</mosaic_0001>

<bundles_post_ra>
// kernel: squeeze.2
= control target key start
LH: loop header
LB: loop body
LE: loop exit
PB: predicated region body
PF: predicated region fallthrough
CT: control target
= control target key end

     0   :  { %s149_s0 = inlined_call_operand.vmem [shape: s32[2,256], index: 0, kind: input, shape index: {}]   ;;  %s150_s1 = inlined_call_operand.hbm [shape: s32[2,16,16], index: 1, kind: output, shape index: {}]  }
   0x1   :  { %v71_v0 = vld [vmem:[%s149_s0 + $0x2] sm:$0x3]  ;;  %v9_v1 = vld [vmem:[%s149_s0] sm:$0x3] }
   0x2   :  { %8 = vst [vmem:[#allocation2 + $0x8] sm:$0x3] %v71_v0  ;;  %10 = vst [vmem:[#allocation2] sm:$0x3] %v9_v1 }
   0x3   :  { %2 = vsyncpa [#allocation1], 0  ;;  %vm12_vm0 = vcmask 130048   ;;  %s104_s0 = smov 112   ;;  %s105_s10 = smov 80  }
   0x4   :  { %s106_s11 = smov 96   ;;  %s107_s12 = smov 64  }
   0x5   :  { %s108_s13 = smov 48   ;;  %s109_s14 = smov 32  }
   0x6   :  { %s110_s15 = smov 16   ;;  %s111_s16 = smov [#allocation0]  }
   0x7   :  { %s65_s17 = sshll.u32 %s111_s16, 4  ;;  %s66_s17 = int_to_ptr.vmem [resolvable:$true] %s65_s17 }
   0x8   :  { %s80_s18 = scalar_lea.vmem %s66_s17, 512  ;;  %p85_p1 = scmp.lt.s32.totalorder %s66_s17, %s66_s17 }
   0x9   :  { %v19_v2 = vld.sshfl [vmem:[#allocation2] sm:$0xff pattern:$0x99999180]   ;;  %p81_p0 = scmp.ne.s32.totalorder %s66_s17, %s80_s18  ;;  %p86_p2 = scmp.lt.s32.totalorder %s80_s18, %s80_s18 }
   0xa   :  { %v11_v3 = vld [vmem:[#allocation2] sm:$0x3]   ;;  %20 = vrot.lane.b32.xlu0 %v19_v2, %s104_s0  ;;  %32 = vrot.lane.b32.xlu1 %v19_v2, %s105_s10  ;;  %v15_v4 = vld [vmem:[#allocation2 + $0x8] sm:$0x3]  }
   0xb   :  { %13 = vst.msk [vmem:[#allocation0] ss:$16 sm:$0x3] %vm12_vm0, %v11_v3   ;;  %18 = vst.msk [vmem:[#allocation0 + $0x8] ss:$16 sm:$0x3] %vm12_vm0, %v15_v4   ;;  %p87_p3 = por %p86_p2, %p85_p1 }
   0xd   :  { %p88_p4 = pnand %p87_p3, %p81_p0 }
   0xe   :  { %26 = vrot.lane.b32.xlu0 %v19_v2, %s106_s11  ;;  %38 = vrot.lane.b32.xlu1 %v19_v2, %s107_s12 }
  0x12   :  { %44 = vrot.lane.b32.xlu0 %v19_v2, %s108_s13  ;;  %50 = vrot.lane.b32.xlu1 %v19_v2, %s109_s14 }
  0x16   :  { %56 = vrot.lane.b32.xlu0 %v19_v2, %s110_s15 }
  0x7c   :  { %v21_v5 = vpop.permute.xlu0 %20   ;;  %v33_v6 = vpop.permute.xlu1 %32  }
  0x7d   :  { %24 = vst.msk [vmem:[#allocation0 + $0x1] ss:$8 sm:$0xf] %vm12_vm0, %v21_v5   ;;  %36 = vst.msk [vmem:[#allocation0 + $0x3] ss:$8 sm:$0xf] %vm12_vm0, %v33_v6  }
  0x80   :  { %v27_v7 = vpop.permute.xlu0 %26   ;;  %v39_v8 = vpop.permute.xlu1 %38  }
  0x81   :  { %30 = vst.msk [vmem:[#allocation0 + $0x2] ss:$8 sm:$0xf] %vm12_vm0, %v27_v7   ;;  %42 = vst.msk [vmem:[#allocation0 + $0x4] ss:$8 sm:$0xf] %vm12_vm0, %v39_v8  }
  0x84   :  { %v45_v9 = vpop.permute.xlu0 %44   ;;  %v51_v10 = vpop.permute.xlu1 %50  }
  0x85   :  { %48 = vst.msk [vmem:[#allocation0 + $0x5] ss:$8 sm:$0xf] %vm12_vm0, %v45_v9   ;;  %54 = vst.msk [vmem:[#allocation0 + $0x6] ss:$8 sm:$0xf] %vm12_vm0, %v51_v10  }
  0x88   :  { %v57_v11 = vpop.permute.xlu0 %56  }
  0x89   :  { %60 = vst.msk [vmem:[#allocation0 + $0x7] ss:$8 sm:$0xf] %vm12_vm0, %v57_v11  }
  0x8a   :  { %91 = shalt.err (!%p88_p4)
}
  0x8b   :  { %s92_s21 = scalar_lea.hbm %s150_s1, 512 }
  0x8c   :  { %p93_p5 = scmp.ne.s32.totalorder %s150_s1, %s92_s21  ;;  %p96_p6 = scmp.lt.u32.totalorder %s92_s21, %s150_s1 }
  0x8e   :  { %p98_p7 = pnand %p96_p6, %p93_p5 }
  0x90   :  { %101 = shalt.err (!%p98_p7)
}
  0x91   :  { %68 = dma.vmem_to_hbm [thread:$0]  %s66_s17, 512, %s150_s1, [#allocation1]  }
  0x92   :  { %102 = dma.done.wait [#allocation1], 512  }
  0x93   :  { %103 = vsyncadd [#allocation1], 4294966784 }
  0x94   :  { %70 = vsyncpa [#allocation1], 1 }

// kernel: vq_module_forward.1
= control target key start
LH: loop header
LB: loop body
LE: loop exit
PB: predicated region body
PF: predicated region fallthrough
CT: control target
= control target key end

     0   :  { %s2286_s21 = smov 0   ;;  %s2288_s22 = smov 0   ;;  %s3508_s0 = inlined_call_operand.vmem [shape: f32[2,32,256], index: 0, kind: input, shape index: {}]   ;;  %s3509_s1 = inlined_call_operand.vmem [shape: f32[256,32], index: 1, kind: input, shape index: {}]   ;;  %s3510_s2 = inlined_call_operand.vmem [shape: f32[32,256], index: 2, kind: input, shape index: {}]   ;;  %s3511_s3 = inlined_call_operand.vmem [shape: f32[256,1], index: 3, kind: input, shape index: {}]   ;;  %s3512_s4 = inlined_call_operand.vmem [shape: f32[2,32,256], index: 4, kind: output, shape index: {0}]   ;;  %s3513_s5 = inlined_call_operand.vmem [shape: s32[2,1,256], index: 5, kind: output, shape index: {1}]   ;;  %s3514_s6 = inlined_call_operand.vmem [shape: f32[2,1,1,128], index: 6, kind: output, shape index: {2}]  }
   0x1   :  { %s2290_s23 = smov 0  }
   0x2 LB: > { %s29_s24 = sadd.s32 1, %s2241_s22  ;;  %p1941_p0 = scmp.ge.s32.totalorder %s2245_s23, 1  ;;  %s2245_s23 = sphi %s2290_s23, %s17_s23   ;;  %s2241_s22 = sphi %s2288_s22, %s3714_s22   ;;  %s2237_s21 = sphi %s2286_s21, %s3713_s21  }
   0x3   : > { %p31_p1 = scmp.ge.s32.totalorder %s29_s24, 2  ;;  %p242_p2 = scmp.lt.s32.totalorder %s2245_s23, 3 }
   0x5   : > { %s3716_s24 = smov (%p31_p1, %s29_s24), 0  ;;  %p243_p3 = pnand %p1941_p0, %p242_p2 }
   0x7   : > { %246 = sbr.rel (%p243_p3) target bundleno = 979 (0x3d3), region = 36 }
   0xe   : > { %p295_p4 = scmp.lt.s32.totalorder %s2237_s21, 1  ;;  %v2247_v0 = vmov 0.0   ;;  %v2248_v1 = vmov 0   ;;  %v377_v14 = vld [vmem:[%s3511_s3] sm:$0xff]  ;;  %v379_v15 = vld [vmem:[%s3511_s3 + $0x10] sm:$0xff]  ;;  %v378_v16 = vld [vmem:[%s3511_s3 + $0x8] sm:$0xff] }
   0xf   : > { %570 = vmatprep.mubr.f32.mxu0 %v2247_v0  ;;  %2213 = vset.pattern.permute.xlu0 %v2248_v1  ;;  %v380_v17 = vld [vmem:[%s3511_s3 + $0x18] sm:$0xff]  ;;  %v337_v18 = vld [vmem:[%s3509_s1] sm:$0xff]  ;;  %vm409_vm0 = vcmask 261120   ;;  %v382_v20 = vld [vmem:[%s3511_s3 + $0x28] sm:$0xff] }
  0x10   : > { %s3718_s21 = smov (!%p295_p4, %s2237_s21), 1  ;;  %2214 = vset.pattern.permute.xlu1 %v2248_v1  ;;  %829 = vperm.xlu0 %2213, %v377_v14   ;;  %v381_v19 = vld [vmem:[%s3511_s3 + $0x20] sm:$0xff]  ;;  %v338_v21 = vld [vmem:[%s3509_s1 + $0x8] sm:$0xff]  ;;  %v383_v22 = vld [vmem:[%s3511_s3 + $0x30] sm:$0xff] }
  0x11   : > { %s2109_s25 = sshll.u32 %s3718_s21, 6  ;;  %839 = vperm.xlu1 %2214, %v379_v15   ;;  %v384_v23 = vld [vmem:[%s3511_s3 + $0x38] sm:$0xff]  ;;  %v339_v24 = vld [vmem:[%s3509_s1 + $0x10] sm:$0xff]  ;;  %v385_v25 = vld [vmem:[%s3511_s3 + $0x40] sm:$0xff]  ;;  %s1946_s9 = sshll.u32 %s3718_s21, 1 }
  0x12   : > { %s2313_s28 = scalar_lea.vmem %s3508_s0, %s2109_s25  ;;  %v386_v26 = vld [vmem:[%s3511_s3 + $0x48] sm:$0xff]  ;;  %v340_v27 = vld [vmem:[%s3509_s1 + $0x18] sm:$0xff]  ;;  %v387_v28 = vld [vmem:[%s3511_s3 + $0x50] sm:$0xff]  ;;  %s321_s12 = scalar_lea.vmem %s3513_s5, %s1946_s9 }
  0x13   : > { %v330_v2 = vld [vmem:[%s2313_s28 + $0x8] sm:$0xff]  ;;  %v332_v3 = vld [vmem:[%s2313_s28 + $0x18] sm:$0xff]  ;;  %v329_v4 = vld [vmem:[%s2313_s28] sm:$0xff]  ;;  %s3477_s11 = scalar_lea.vmem %s3512_s4, %s2109_s25 }
  0x14   : > { %v2111_v5 = vpack.c.bf16 %v332_v3, %v330_v2  ;;  %v331_v6 = vld [vmem:[%s2313_s28 + $0x10] sm:$0xff]  ;;  %v334_v7 = vld [vmem:[%s2313_s28 + $0x28] sm:$0xff]  ;;  %v336_v8 = vld [vmem:[%s2313_s28 + $0x38] sm:$0xff]  ;;  %834 = vperm.xlu0 %2213, %v378_v16  }
  0x15   : > { %v2113_v9 = vpack.c.bf16 %v331_v6, %v329_v4  ;;  %v2115_v10 = vpack.c.bf16 %v336_v8, %v334_v7  ;;  %v333_v11 = vld [vmem:[%s2313_s28 + $0x20] sm:$0xff]  ;;  %v335_v12 = vld [vmem:[%s2313_s28 + $0x30] sm:$0xff]  ;;  %844 = vperm.xlu1 %2214, %v380_v17   ;;  %v388_v29 = vld [vmem:[%s3511_s3 + $0x58] sm:$0xff] }
  0x16   : > { %2112 = vmatprep.subr.bf16.mxu0 %v2111_v5  ;;  %v2117_v13 = vpack.c.bf16 %v335_v12, %v333_v11  ;;  %v341_v30 = vld [vmem:[%s3509_s1 + $0x20] sm:$0xff]  ;;  %v390_v32 = vld [vmem:[%s3511_s3 + $0x68] sm:$0xff]  ;;  %v391_v34 = vld [vmem:[%s3511_s3 + $0x70] sm:$0xff] }
  0x17   : > { %2114 = vmatpush1.bf16.msra.mxu0 %v2113_v9  ;;  %v389_v31 = vld [vmem:[%s3511_s3 + $0x60] sm:$0xff]  ;;  %v342_v33 = vld [vmem:[%s3509_s1 + $0x28] sm:$0xff]  ;;  %v392_v35 = vld [vmem:[%s3511_s3 + $0x78] sm:$0xff] }
  0x18   : > { %2116 = vmatprep.subr.bf16.mxu0 %v2115_v10  ;;  %849 = vperm.xlu0 %2213, %v381_v19   ;;  %v343_v36 = vld [vmem:[%s3509_s1 + $0x30] sm:$0xff]  ;;  %v393_v37 = vld [vmem:[%s3511_s3 + $0x80] sm:$0xff]  ;;  %v394_v38 = vld [vmem:[%s3511_s3 + $0x88] sm:$0xff] }
  0x19   : > { %854 = vperm.xlu1 %2214, %v382_v20   ;;  %v344_v39 = vld [vmem:[%s3509_s1 + $0x38] sm:$0xff]  ;;  %v395_v40 = vld [vmem:[%s3511_s3 + $0x90] sm:$0xff]  ;;  %v345_v42 = vld [vmem:[%s3509_s1 + $0x40] sm:$0xff] }
  0x1a   : > { %v396_v41 = vld [vmem:[%s3511_s3 + $0x98] sm:$0xff]  ;;  %v397_v43 = vld [vmem:[%s3511_s3 + $0xa0] sm:$0xff]  ;;  %v398_v44 = vld [vmem:[%s3511_s3 + $0xa8] sm:$0xff] }
  0x1b   : > { %2118 = vmatpush1.bf16.msra.mxu0 %v2117_v13  ;;  %v346_v45 = vld [vmem:[%s3509_s1 + $0x48] sm:$0xff]  ;;  %v399_v46 = vld [vmem:[%s3511_s3 + $0xb0] sm:$0xff]  ;;  %v400_v47 = vld [vmem:[%s3511_s3 + $0xb8] sm:$0xff] }
  0x1c   : > { %859 = vperm.xlu0 %2213, %v383_v22   ;;  %v347_v48 = vld [vmem:[%s3509_s1 + $0x50] sm:$0xff]  ;;  %v401_v49 = vld [vmem:[%s3511_s3 + $0xc0] sm:$0xff]  ;;  %v402_v50 = vld [vmem:[%s3511_s3 + $0xc8] sm:$0xff] }
  0x1d   : > { %864 = vperm.xlu1 %2214, %v384_v23   ;;  %v348_v51 = vld [vmem:[%s3509_s1 + $0x58] sm:$0xff]  ;;  %v403_v52 = vld [vmem:[%s3511_s3 + $0xd0] sm:$0xff]  ;;  %v349_v54 = vld [vmem:[%s3509_s1 + $0x60] sm:$0xff] }
  0x1e   : > { %1947 = vmatmul.mubr.msk.f32.vlgmr.msra.gmra.mrb[0].mxu0 %vm409_vm0, %v337_v18  ;;  %v404_v53 = vld [vmem:[%s3511_s3 + $0xd8] sm:$0xff]  ;;  %v405_v55 = vld [vmem:[%s3511_s3 + $0xe0] sm:$0xff]  ;;  %v406_v56 = vld [vmem:[%s3511_s3 + $0xe8] sm:$0xff] }
  0x1f   : > { %576 = vmatprep.mubr.f32.mxu0 %v2247_v0  ;;  %v350_v57 = vld [vmem:[%s3509_s1 + $0x68] sm:$0xff]  ;;  %v407_v58 = vld [vmem:[%s3511_s3 + $0xf0] sm:$0xff]  ;;  %v408_v59 = vld [vmem:[%s3511_s3 + $0xf8] sm:$0xff] }
  0x20   : > { %869 = vperm.xlu0 %2213, %v385_v25   ;;  %v351_v60 = vld [vmem:[%s3509_s1 + $0x70] sm:$0xff]  ;;  %v352_v61 = vld [vmem:[%s3509_s1 + $0x78] sm:$0xff]  ;;  %v353_v62 = vld [vmem:[%s3509_s1 + $0x80] sm:$0xff] }
  0x21   : > { %874 = vperm.xlu1 %2214, %v386_v26   ;;  %v354_v63 = vld [vmem:[%s3509_s1 + $0x88] sm:$0xff]  ;;  %v355_v1 = vld [vmem:[%s3509_s1 + $0x90] sm:$0xff]  ;;  %v356_v2 = vld [vmem:[%s3509_s1 + $0x98] sm:$0xff] }
  0x22   : > { %1948 = vmatmul.mubr.msk.f32.gmra.mrb[2].mxu0 %vm409_vm0, %v338_v21  ;;  %v357_v3 = vld [vmem:[%s3509_s1 + $0xa0] sm:$0xff]  ;;  %v358_v4 = vld [vmem:[%s3509_s1 + $0xa8] sm:$0xff]  ;;  %v359_v5 = vld [vmem:[%s3509_s1 + $0xb0] sm:$0xff] }
  0x23   : > { %582 = vmatprep.mubr.f32.mxu0 %v2247_v0  ;;  %v360_v6 = vld [vmem:[%s3509_s1 + $0xb8] sm:$0xff]  ;;  %v361_v7 = vld [vmem:[%s3509_s1 + $0xc0] sm:$0xff]  ;;  %v362_v8 = vld [vmem:[%s3509_s1 + $0xc8] sm:$0xff] }
  0x24   : > { %879 = vperm.xlu0 %2213, %v387_v28   ;;  %v363_v9 = vld [vmem:[%s3509_s1 + $0xd0] sm:$0xff]  ;;  %v364_v10 = vld [vmem:[%s3509_s1 + $0xd8] sm:$0xff]  ;;  %v365_v11 = vld [vmem:[%s3509_s1 + $0xe0] sm:$0xff] }
  0x25   : > { %884 = vperm.xlu1 %2214, %v388_v29   ;;  %v366_v12 = vld [vmem:[%s3509_s1 + $0xe8] sm:$0xff]  ;;  %v367_v13 = vld [vmem:[%s3509_s1 + $0xf0] sm:$0xff]  ;;  %v368_v14 = vld [vmem:[%s3509_s1 + $0xf8] sm:$0xff] }
  0x26   : > { %1949 = vmatmul.mubr.msk.f32.gmra.mrb[4].mxu0 %vm409_vm0, %v339_v24 }
  0x27   : > { %588 = vmatprep.mubr.f32.mxu0 %v2247_v0 }
  0x28   : > { %889 = vperm.xlu0 %2213, %v389_v31  }
  0x29   : > { %894 = vperm.xlu1 %2214, %v390_v32  }
  0x2a   : > { %1950 = vmatmul.mubr.msk.f32.gmra.mrb[6].mxu0 %vm409_vm0, %v340_v27 }
  0x2b   : > { %594 = vmatprep.mubr.f32.mxu0 %v2247_v0 }
  0x2c   : > { %899 = vperm.xlu0 %2213, %v391_v34  }
  0x2d   : > { %904 = vperm.xlu1 %2214, %v392_v35  }
  0x2e   : > { %1951 = vmatmul.mubr.msk.f32.gmra.mrb[8].mxu0 %vm409_vm0, %v341_v30 }
  0x2f   : > { %600 = vmatprep.mubr.f32.mxu0 %v2247_v0 }
  0x30   : > { %909 = vperm.xlu0 %2213, %v393_v37  }
  0x31   : > { %914 = vperm.xlu1 %2214, %v394_v38  }
  0x32   : > { %1952 = vmatmul.mubr.msk.f32.gmra.mrb[10].mxu0 %vm409_vm0, %v342_v33 }
  0x33   : > { %606 = vmatprep.mubr.f32.mxu0 %v2247_v0 }
  0x34   : > { %919 = vperm.xlu0 %2213, %v395_v40  }
  0x35   : > { %924 = vperm.xlu1 %2214, %v396_v41  }
  0x36   : > { %1953 = vmatmul.mubr.msk.f32.gmra.mrb[12].mxu0 %vm409_vm0, %v343_v36 }
  0x37   : > { %612 = vmatprep.mubr.f32.mxu0 %v2247_v0 }
  0x38   : > { %929 = vperm.xlu0 %2213, %v397_v43  }
  0x39   : > { %934 = vperm.xlu1 %2214, %v398_v44  }
  0x3a   : > { %1954 = vmatmul.mubr.msk.f32.gmra.mrb[14].mxu0 %vm409_vm0, %v344_v39 }
  0x3b   : > { %618 = vmatprep.mubr.f32.mxu0 %v2247_v0 }
  0x3c   : > { %939 = vperm.xlu0 %2213, %v399_v46  }
  0x3d   : > { %944 = vperm.xlu1 %2214, %v400_v47  }
  0x3e   : > { %1955 = vmatmul.mubr.msk.f32.gmra.mrb[16].mxu0 %vm409_vm0, %v345_v42 }
  0x3f   : > { %624 = vmatprep.mubr.f32.mxu0 %v2247_v0 }
  0x40   : > { %949 = vperm.xlu0 %2213, %v401_v49  }
  0x41   : > { %954 = vperm.xlu1 %2214, %v402_v50  }
  0x42   : > { %1956 = vmatmul.mubr.msk.f32.gmra.mrb[18].mxu0 %vm409_vm0, %v346_v45 }
  0x43   : > { %630 = vmatprep.mubr.f32.mxu0 %v2247_v0 }
  0x44   : > { %959 = vperm.xlu0 %2213, %v403_v52  }
  0x45   : > { %964 = vperm.xlu1 %2214, %v404_v53  }
  0x46   : > { %1957 = vmatmul.mubr.msk.f32.gmra.mrb[20].mxu0 %vm409_vm0, %v347_v48 }
  0x47   : > { %636 = vmatprep.mubr.f32.mxu0 %v2247_v0 }
  0x48   : > { %969 = vperm.xlu0 %2213, %v405_v55  }
  0x49   : > { %974 = vperm.xlu1 %2214, %v406_v56  }
  0x4a   : > { %1958 = vmatmul.mubr.msk.f32.gmra.mrb[22].mxu0 %vm409_vm0, %v348_v51 }
  0x4b   : > { %642 = vmatprep.mubr.f32.mxu0 %v2247_v0 }
  0x4c   : > { %979 = vperm.xlu0 %2213, %v407_v58  }
  0x4d   : > { %984 = vperm.xlu1 %2214, %v408_v59  }
  0x4e   : > { %1959 = vmatmul.mubr.msk.f32.gmra.mrb[24].mxu0 %vm409_vm0, %v349_v54 }
  0x4f   : > { %648 = vmatprep.mubr.f32.mxu0 %v2247_v0 }
  0x52   : > { %1960 = vmatmul.mubr.msk.f32.gmra.mrb[26].mxu0 %vm409_vm0, %v350_v57 }
  0x53   : > { %654 = vmatprep.mubr.f32.mxu0 %v2247_v0 }
  0x56   : > { %1961 = vmatmul.mubr.msk.f32.gmra.mrb[28].mxu0 %vm409_vm0, %v351_v60 }
  0x57   : > { %660 = vmatprep.mubr.f32.mxu0 %v2247_v0 }
  0x5a   : > { %1962 = vmatmul.mubr.msk.f32.gmra.mrb[30].mxu0 %vm409_vm0, %v352_v61 }
  0x5b   : > { %666 = vmatprep.mubr.f32.mxu0 %v2247_v0 }
  0x5e   : > { %1963 = vmatmul.mubr.msk.f32.gmra.mrb[32].mxu0 %vm409_vm0, %v353_v62 }
  0x5f   : > { %672 = vmatprep.mubr.f32.mxu0 %v2247_v0 }
  0x62   : > { %1964 = vmatmul.mubr.msk.f32.gmra.mrb[34].mxu0 %vm409_vm0, %v354_v63 }
  0x63   : > { %678 = vmatprep.mubr.f32.mxu0 %v2247_v0 }
  0x66   : > { %1965 = vmatmul.mubr.msk.f32.gmra.mrb[36].mxu0 %vm409_vm0, %v355_v1 }
  0x67   : > { %684 = vmatprep.mubr.f32.mxu0 %v2247_v0 }
  0x6a   : > { %1966 = vmatmul.mubr.msk.f32.gmra.mrb[38].mxu0 %vm409_vm0, %v356_v2 }
  0x6b   : > { %690 = vmatprep.mubr.f32.mxu0 %v2247_v0 }
  0x6e   : > { %1967 = vmatmul.mubr.msk.f32.gmra.mrb[40].mxu0 %vm409_vm0, %v357_v3 }
  0x6f   : > { %696 = vmatprep.mubr.f32.mxu0 %v2247_v0 }
  0x72   : > { %1968 = vmatmul.mubr.msk.f32.gmra.mrb[42].mxu0 %vm409_vm0, %v358_v4 }
  0x73   : > { %702 = vmatprep.mubr.f32.mxu0 %v2247_v0 }
  0x76   : > { %1969 = vmatmul.mubr.msk.f32.gmra.mrb[44].mxu0 %vm409_vm0, %v359_v5 }
  0x77   : > { %708 = vmatprep.mubr.f32.mxu0 %v2247_v0 }
  0x7a   : > { %1970 = vmatmul.mubr.msk.f32.gmra.mrb[46].mxu0 %vm409_vm0, %v360_v6 }
  0x7b   : > { %714 = vmatprep.mubr.f32.mxu0 %v2247_v0 }
  0x7e   : > { %1971 = vmatmul.mubr.msk.f32.gmra.mrb[48].mxu0 %vm409_vm0, %v361_v7 }
  0x7f   : > { %720 = vmatprep.mubr.f32.mxu0 %v2247_v0 }
  0x82   : > { %1972 = vmatmul.mubr.msk.f32.gmra.mrb[50].mxu0 %vm409_vm0, %v362_v8 }
  0x83   : > { %726 = vmatprep.mubr.f32.mxu0 %v2247_v0 }
  0x86   : > { %1973 = vmatmul.mubr.msk.f32.gmra.mrb[52].mxu0 %vm409_vm0, %v363_v9 }
  0x87   : > { %732 = vmatprep.mubr.f32.mxu0 %v2247_v0 }
  0x8a   : > { %1974 = vmatmul.mubr.msk.f32.gmra.mrb[54].mxu0 %vm409_vm0, %v364_v10 }
  0x8b   : > { %738 = vmatprep.mubr.f32.mxu0 %v2247_v0 }
  0x8e   : > { %1975 = vmatmul.mubr.msk.f32.gmra.mrb[56].mxu0 %vm409_vm0, %v365_v11 }
  0x8f   : > { %744 = vmatprep.mubr.f32.mxu0 %v2247_v0  ;;  %v830_v19 = vpop.permute.xlu0 %829 }
  0x90   : > { %v840_v22 = vpop.permute.xlu1 %839 }
  0x92   : > { %1976 = vmatmul.mubr.msk.f32.gmra.mrb[58].mxu0 %vm409_vm0, %v366_v12 }
  0x93   : > { %750 = vmatprep.mubr.f32.mxu0 %v2247_v0  ;;  %v835_v31 = vpop.permute.xlu0 %834 }
  0x94   : > { %v845_v38 = vpop.permute.xlu1 %844 }
  0x96   : > { %1977 = vmatmul.mubr.msk.f32.gmra.mrb[60].mxu0 %vm409_vm0, %v367_v13 }
  0x97   : > { %756 = vmatprep.mubr.f32.mxu0 %v2247_v0  ;;  %v850_v49 = vpop.permute.xlu0 %849 }
  0x98   : > { %v855_v57 = vpop.permute.xlu1 %854 }
  0x9a   : > { %1978 = vmatmul.mubr.msk.f32.gmra.mrb[62].mxu0 %vm409_vm0, %v368_v14 }
  0x9b   : > { %v860_v3 = vpop.permute.xlu0 %859 }
  0x9c   : > { %v865_v12 = vpop.permute.xlu1 %864 }
  0xf1   : > { %v572_v15 = vpop.f32.mrb[0].mxu0 }
  0xf2   : > { %v574_v16 = vpop.f32.mrb[1].mxu0  ;;  %v763_v20 = vmul.f32 2.0, %v572_v15 }
  0xf3   : > { %v764_v21 = vmul.f32 2.0, %v574_v16 }
  0xf4   : > { %v2578_v27 = vsub.f32 %v830_v19, %v763_v20 }
  0xf5   : > { %v578_v17 = vpop.f32.mrb[2].mxu0  ;;  %v2582_v29 = vsub.f32 %v830_v19, %v764_v21  ;;  %v870_v21 = vpop.permute.xlu0 %869 }
  0xf6   : > { %v580_v18 = vpop.f32.mrb[3].mxu0  ;;  %v765_v0 = vmul.f32 2.0, %v578_v17 }
  0xf7   : > { %v766_v30 = vmul.f32 2.0, %v580_v18 }
  0xf8   : > { %v2590_v40 = vsub.f32 %v835_v31, %v765_v0 }
  0xf9   : > { %v584_v23 = vpop.f32.mrb[4].mxu0  ;;  %v2594_v42 = vsub.f32 %v835_v31, %v766_v30 }
  0xfa   : > { %v767_v24 = vmul.f32 2.0, %v584_v23  ;;  %v586_v25 = vpop.f32.mrb[5].mxu0 }
  0xfb   : > { %v768_v26 = vmul.f32 2.0, %v586_v25 }
  0xfc   : > { %v2580_v28 = vsub.f32 %v840_v22, %v767_v24 }
  0xfd   : > { %v2584_v32 = vsub.f32 %v840_v22, %v768_v26  ;;  %v590_v33 = vpop.f32.mrb[6].mxu0 }
  0xfe   : > { %v1051_v34 = vmin.f32 %v2578_v27, %v2580_v28  ;;  %v769_v35 = vmul.f32 2.0, %v590_v33  ;;  %v592_v36 = vpop.f32.mrb[7].mxu0  ;;  %v875_v33 = vpop.permute.xlu1 %874 }
  0xff   : > { %v1088_v37 = vmin.f32 %v2582_v29, %v2584_v32  ;;  %v770_v39 = vmul.f32 2.0, %v592_v36 }
 0x100   : > { %v2592_v41 = vsub.f32 %v845_v38, %v769_v35 }
 0x101   : > { %v2596_v43 = vsub.f32 %v845_v38, %v770_v39  ;;  %v596_v44 = vpop.f32.mrb[8].mxu0 }
 0x102   : > { %v1052_v45 = vmin.f32 %v2590_v40, %v2592_v41  ;;  %v771_v46 = vmul.f32 2.0, %v596_v44  ;;  %v598_v47 = vpop.f32.mrb[9].mxu0 }
 0x103   : > { %v1089_v48 = vmin.f32 %v2594_v42, %v2596_v43  ;;  %v772_v50 = vmul.f32 2.0, %v598_v47 }
 0x104   : > { %v2602_v51 = vsub.f32 %v850_v49, %v771_v46  ;;  %v880_v46 = vpop.permute.xlu0 %879 }
 0x105   : > { %v2604_v52 = vsub.f32 %v850_v49, %v772_v50  ;;  %v602_v53 = vpop.f32.mrb[10].mxu0 }
 0x106   : > { %v1053_v54 = vmin.f32 %v1051_v34, %v2602_v51  ;;  %v773_v55 = vmul.f32 2.0, %v602_v53  ;;  %v604_v56 = vpop.f32.mrb[11].mxu0 }
 0x107   : > { %v1090_v58 = vmin.f32 %v1088_v37, %v2604_v52  ;;  %v774_v59 = vmul.f32 2.0, %v604_v56 }
 0x108   : > { %v2608_v60 = vsub.f32 %v855_v57, %v773_v55 }
 0x109   : > { %v2610_v61 = vsub.f32 %v855_v57, %v774_v59  ;;  %v608_v62 = vpop.f32.mrb[12].mxu0  ;;  %v885_v57 = vpop.permute.xlu1 %884 }
 0x10a   : > { %v1054_v63 = vmin.f32 %v1052_v45, %v2608_v60  ;;  %v775_v1 = vmul.f32 2.0, %v608_v62  ;;  %v610_v2 = vpop.f32.mrb[13].mxu0 }
 0x10b   : > { %v1091_v4 = vmin.f32 %v1089_v48, %v2610_v61  ;;  %v776_v5 = vmul.f32 2.0, %v610_v2 }
 0x10c   : > { %v2614_v6 = vsub.f32 %v860_v3, %v775_v1 }
 0x10d   : > { %v2616_v7 = vsub.f32 %v860_v3, %v776_v5  ;;  %v614_v8 = vpop.f32.mrb[14].mxu0  ;;  %v890_v5 = vpop.permute.xlu0 %889 }
 0x10e   : > { %v1055_v9 = vmin.f32 %v1053_v54, %v2614_v6  ;;  %v777_v10 = vmul.f32 2.0, %v614_v8  ;;  %v616_v11 = vpop.f32.mrb[15].mxu0 }
 0x10f   : > { %v1092_v13 = vmin.f32 %v1090_v58, %v2616_v7  ;;  %v778_v14 = vmul.f32 2.0, %v616_v11 }
 0x110   : > { %v2620_v15 = vsub.f32 %v865_v12, %v777_v10 }
 0x111   : > { %v2622_v16 = vsub.f32 %v865_v12, %v778_v14  ;;  %v620_v17 = vpop.f32.mrb[16].mxu0 }
 0x112   : > { %v1056_v18 = vmin.f32 %v1054_v63, %v2620_v15  ;;  %v779_v19 = vmul.f32 2.0, %v620_v17  ;;  %v622_v20 = vpop.f32.mrb[17].mxu0 }
 0x113   : > { %v1093_v22 = vmin.f32 %v1091_v4, %v2622_v16  ;;  %v780_v23 = vmul.f32 2.0, %v622_v20 }
 0x114   : > { %v2626_v24 = vsub.f32 %v870_v21, %v779_v19 }
 0x115   : > { %v2628_v25 = vsub.f32 %v870_v21, %v780_v23  ;;  %v626_v26 = vpop.f32.mrb[18].mxu0 }
 0x116   : > { %v1057_v0 = vmin.f32 %v1055_v9, %v2626_v24  ;;  %v781_v30 = vmul.f32 2.0, %v626_v26  ;;  %v628_v31 = vpop.f32.mrb[19].mxu0 }
 0x117   : > { %v1094_v34 = vmin.f32 %v1092_v13, %v2628_v25  ;;  %v782_v35 = vmul.f32 2.0, %v628_v31  ;;  %v900_v31 = vpop.permute.xlu0 %899 }
 0x118   : > { %v2632_v36 = vsub.f32 %v875_v33, %v781_v30 }
 0x119   : > { %v2634_v37 = vsub.f32 %v875_v33, %v782_v35  ;;  %v632_v38 = vpop.f32.mrb[20].mxu0 }
 0x11a   : > { %v1058_v39 = vmin.f32 %v1056_v18, %v2632_v36  ;;  %v783_v44 = vmul.f32 2.0, %v632_v38  ;;  %v634_v45 = vpop.f32.mrb[21].mxu0  ;;  %v895_v18 = vpop.permute.xlu1 %894 }
 0x11b   : > { %v1095_v47 = vmin.f32 %v1093_v22, %v2634_v37  ;;  %v784_v48 = vmul.f32 2.0, %v634_v45 }
 0x11c   : > { %v2638_v49 = vsub.f32 %v880_v46, %v783_v44 }
 0x11d   : > { %v2640_v50 = vsub.f32 %v880_v46, %v784_v48  ;;  %v638_v53 = vpop.f32.mrb[22].mxu0 }
 0x11e   : > { %v1059_v54 = vmin.f32 %v1057_v0, %v2638_v49  ;;  %v785_v55 = vmul.f32 2.0, %v638_v53  ;;  %v640_v56 = vpop.f32.mrb[23].mxu0 }
 0x11f   : > { %v1096_v58 = vmin.f32 %v1094_v34, %v2640_v50  ;;  %v786_v59 = vmul.f32 2.0, %v640_v56 }
 0x120   : > { %v2644_v62 = vsub.f32 %v885_v57, %v785_v55 }
 0x121   : > { %v2646_v63 = vsub.f32 %v885_v57, %v786_v59  ;;  %v644_v1 = vpop.f32.mrb[24].mxu0 }
 0x122   : > { %v1060_v2 = vmin.f32 %v1058_v39, %v2644_v62  ;;  %v787_v3 = vmul.f32 2.0, %v644_v1  ;;  %v646_v4 = vpop.f32.mrb[25].mxu0  ;;  %v910_v1 = vpop.permute.xlu0 %909 }
 0x123   : > { %3578 = vst [vmem:[#allocation2_spill] sm:$0xff] %v2646_v63  ;;  %v1097_v8 = vmin.f32 %v1095_v47, %v2646_v63  ;;  %v788_v9 = vmul.f32 2.0, %v646_v4  ;;  %v905_v47 = vpop.permute.xlu1 %904 }
 0x124   : > { %v2650_v10 = vsub.f32 %v890_v5, %v787_v3 }
 0x125   : > { %v2652_v11 = vsub.f32 %v890_v5, %v788_v9  ;;  %v650_v12 = vpop.f32.mrb[26].mxu0 }
 0x126   : > { %v1061_v13 = vmin.f32 %v1059_v54, %v2650_v10  ;;  %v789_v14 = vmul.f32 2.0, %v650_v12  ;;  %v652_v17 = vpop.f32.mrb[27].mxu0 }
 0x127   : > { %3579 = vst [vmem:[#allocation3_spill] sm:$0xff] %v2652_v11  ;;  %v1098_v19 = vmin.f32 %v1096_v58, %v2652_v11  ;;  %v790_v20 = vmul.f32 2.0, %v652_v17 }
 0x128   : > { %v2656_v21 = vsub.f32 %v895_v18, %v789_v14  ;;  %v915_v14 = vpop.permute.xlu1 %914 }
 0x129   : > { %v2658_v22 = vsub.f32 %v895_v18, %v790_v20  ;;  %v656_v23 = vpop.f32.mrb[28].mxu0 }
 0x12a   : > { %v1062_v26 = vmin.f32 %v1060_v2, %v2656_v21  ;;  %v791_v0 = vmul.f32 2.0, %v656_v23  ;;  %v658_v30 = vpop.f32.mrb[29].mxu0 }
 0x12b   : > { %3580 = vst [vmem:[#allocation4_spill] sm:$0xff] %v2658_v22  ;;  %v1099_v33 = vmin.f32 %v1097_v8, %v2658_v22  ;;  %v792_v34 = vmul.f32 2.0, %v658_v30 }
 0x12c   : > { %v2662_v35 = vsub.f32 %v900_v31, %v791_v0 }
 0x12d   : > { %v2664_v38 = vsub.f32 %v900_v31, %v792_v34  ;;  %v662_v39 = vpop.f32.mrb[30].mxu0  ;;  %v920_v31 = vpop.permute.xlu0 %919 }
 0x12e   : > { %v1063_v44 = vmin.f32 %v1061_v13, %v2662_v35  ;;  %v793_v45 = vmul.f32 2.0, %v662_v39  ;;  %v664_v46 = vpop.f32.mrb[31].mxu0 }
 0x12f   : > { %3581 = vst [vmem:[#allocation5_spill] sm:$0xff] %v2664_v38  ;;  %v1100_v48 = vmin.f32 %v1098_v19, %v2664_v38  ;;  %v794_v53 = vmul.f32 2.0, %v664_v46 }
 0x130   : > { %v2668_v54 = vsub.f32 %v905_v47, %v793_v45 }
 0x131   : > { %v2670_v55 = vsub.f32 %v905_v47, %v794_v53  ;;  %v668_v56 = vpop.f32.mrb[32].mxu0  ;;  %v925_v53 = vpop.permute.xlu1 %924 }
 0x132   : > { %v1064_v57 = vmin.f32 %v1062_v26, %v2668_v54  ;;  %v795_v58 = vmul.f32 2.0, %v668_v56  ;;  %v670_v59 = vpop.f32.mrb[33].mxu0 }
 0x133   : > { %3582 = vst [vmem:[#allocation6_spill] sm:$0xff] %v2670_v55  ;;  %v1101_v2 = vmin.f32 %v1099_v33, %v2670_v55  ;;  %v796_v3 = vmul.f32 2.0, %v670_v59 }
 0x134   : > { %v2674_v4 = vsub.f32 %v910_v1, %v795_v58 }
 0x135   : > { %v2676_v5 = vsub.f32 %v910_v1, %v796_v3  ;;  %v674_v8 = vpop.f32.mrb[34].mxu0 }
 0x136   : > { %v1065_v9 = vmin.f32 %v1063_v44, %v2674_v4  ;;  %v797_v12 = vmul.f32 2.0, %v674_v8  ;;  %v676_v13 = vpop.f32.mrb[35].mxu0 }
 0x137   : > { %3583 = vst [vmem:[#allocation7_spill] sm:$0xff] %v2676_v5  ;;  %v1102_v17 = vmin.f32 %v1100_v48, %v2676_v5  ;;  %v798_v18 = vmul.f32 2.0, %v676_v13 }
 0x138   : > { %v2680_v19 = vsub.f32 %v915_v14, %v797_v12  ;;  %v930_v12 = vpop.permute.xlu0 %929 }
 0x139   : > { %v2682_v20 = vsub.f32 %v915_v14, %v798_v18  ;;  %v680_v23 = vpop.f32.mrb[36].mxu0 }
 0x13a   : > { %v1066_v26 = vmin.f32 %v1064_v57, %v2680_v19  ;;  %v799_v0 = vmul.f32 2.0, %v680_v23  ;;  %v682_v30 = vpop.f32.mrb[37].mxu0 }
 0x13b   : > { %3584 = vst [vmem:[#allocation8_spill] sm:$0xff] %v2682_v20  ;;  %v1103_v33 = vmin.f32 %v1101_v2, %v2682_v20  ;;  %v800_v34 = vmul.f32 2.0, %v682_v30 }
 0x13c   : > { %v2686_v39 = vsub.f32 %v920_v31, %v799_v0 }
 0x13d   : > { %v2688_v44 = vsub.f32 %v920_v31, %v800_v34  ;;  %v686_v45 = vpop.f32.mrb[38].mxu0  ;;  %v935_v31 = vpop.permute.xlu1 %934 }
 0x13e   : > { %v1067_v46 = vmin.f32 %v1065_v9, %v2686_v39  ;;  %v801_v47 = vmul.f32 2.0, %v686_v45  ;;  %v688_v48 = vpop.f32.mrb[39].mxu0 }
 0x13f   : > { %3585 = vst [vmem:[#allocation9_spill] sm:$0xff] %v2688_v44  ;;  %v1104_v56 = vmin.f32 %v1102_v17, %v2688_v44  ;;  %v802_v58 = vmul.f32 2.0, %v688_v48 }
 0x140   : > { %v2692_v57 = vsub.f32 %v925_v53, %v801_v47 }
 0x141   : > { %v2694_v59 = vsub.f32 %v925_v53, %v802_v58  ;;  %v692_v1 = vpop.f32.mrb[40].mxu0 }
 0x142   : > { %v1068_v2 = vmin.f32 %v1066_v26, %v2692_v57  ;;  %v803_v3 = vmul.f32 2.0, %v692_v1  ;;  %v694_v8 = vpop.f32.mrb[41].mxu0  ;;  %v940_v1 = vpop.permute.xlu0 %939 }
 0x143   : > { %3586 = vst [vmem:[#allocation10_spill] sm:$0xff] %v2694_v59  ;;  %v1105_v13 = vmin.f32 %v1103_v33, %v2694_v59  ;;  %v804_v14 = vmul.f32 2.0, %v694_v8 }
 0x144   : > { %v2698_v9 = vsub.f32 %v930_v12, %v803_v3 }
 0x145   : > { %v2700_v18 = vsub.f32 %v930_v12, %v804_v14  ;;  %v698_v23 = vpop.f32.mrb[42].mxu0 }
 0x146   : > { %v1069_v17 = vmin.f32 %v1067_v46, %v2698_v9  ;;  %v805_v0 = vmul.f32 2.0, %v698_v23  ;;  %v700_v30 = vpop.f32.mrb[43].mxu0 }
 0x147   : > { %3587 = vst [vmem:[#allocation11_spill] sm:$0xff] %v2700_v18  ;;  %v1106_v34 = vmin.f32 %v1104_v56, %v2700_v18  ;;  %v806_v45 = vmul.f32 2.0, %v700_v30  ;;  %v945_v30 = vpop.permute.xlu1 %944 }
 0x148   : > { %v2704_v26 = vsub.f32 %v935_v31, %v805_v0 }
 0x149   : > { %v2706_v47 = vsub.f32 %v935_v31, %v806_v45  ;;  %v704_v48 = vpop.f32.mrb[44].mxu0 }
 0x14a   : > { %v1070_v33 = vmin.f32 %v1068_v2, %v2704_v26  ;;  %v807_v53 = vmul.f32 2.0, %v704_v48  ;;  %v706_v58 = vpop.f32.mrb[45].mxu0 }
 0x14b   : > { %3588 = vst [vmem:[#allocation12_spill] sm:$0xff] %v2706_v47  ;;  %v1107_v3 = vmin.f32 %v1105_v13, %v2706_v47  ;;  %v808_v8 = vmul.f32 2.0, %v706_v58 }
 0x14c   : > { %v2710_v46 = vsub.f32 %v940_v1, %v807_v53 }
 0x14d   : > { %v2712_v12 = vsub.f32 %v940_v1, %v808_v8  ;;  %v710_v14 = vpop.f32.mrb[46].mxu0  ;;  %v950_v1 = vpop.permute.xlu0 %949 }
 0x14e   : > { %3589 = vst [vmem:[#allocation13_spill] sm:$0xff] %v2710_v46  ;;  %v1071_v56 = vmin.f32 %v1069_v17, %v2710_v46  ;;  %v809_v23 = vmul.f32 2.0, %v710_v14  ;;  %v712_v0 = vpop.f32.mrb[47].mxu0 }
 0x14f   : > { %3590 = vst [vmem:[#allocation14_spill] sm:$0xff] %v2712_v12  ;;  %v1108_v31 = vmin.f32 %v1106_v34, %v2712_v12  ;;  %v810_v45 = vmul.f32 2.0, %v712_v0 }
 0x150   : > { %v2716_v2 = vsub.f32 %v945_v30, %v809_v23 }
 0x151   : > { %v2718_v48 = vsub.f32 %v945_v30, %v810_v45  ;;  %v716_v18 = vpop.f32.mrb[48].mxu0  ;;  %v955_v30 = vpop.permute.xlu1 %954 }
 0x152   : > { %3591 = vst [vmem:[#allocation15_spill] sm:$0xff] %v2716_v2  ;;  %v1072_v13 = vmin.f32 %v1070_v33, %v2716_v2  ;;  %v811_v53 = vmul.f32 2.0, %v716_v18  ;;  %v718_v58 = vpop.f32.mrb[49].mxu0 }
 0x153   : > { %3592 = vst [vmem:[#allocation16_spill] sm:$0xff] %v2718_v48  ;;  %v1109_v8 = vmin.f32 %v1107_v3, %v2718_v48  ;;  %v812_v47 = vmul.f32 2.0, %v718_v58 }
 0x154   : > { %v2722_v17 = vsub.f32 %v950_v1, %v811_v53 }
 0x155   : > { %v2724_v14 = vsub.f32 %v950_v1, %v812_v47  ;;  %v722_v59 = vpop.f32.mrb[50].mxu0  ;;  %v960_v47 = vpop.permute.xlu0 %959 }
 0x156   : > { %3593 = vst [vmem:[#allocation17_spill] sm:$0xff] %v2722_v17  ;;  %v1073_v34 = vmin.f32 %v1071_v56, %v2722_v17  ;;  %v813_v23 = vmul.f32 2.0, %v722_v59  ;;  %v724_v0 = vpop.f32.mrb[51].mxu0 }
 0x157   : > { %3594 = vst [vmem:[#allocation18_spill] sm:$0xff] %v2724_v14  ;;  %v1110_v45 = vmin.f32 %v1108_v31, %v2724_v14  ;;  %v814_v12 = vmul.f32 2.0, %v724_v0 }
 0x158   : > { %v2728_v33 = vsub.f32 %v955_v30, %v813_v23 }
 0x159   : > { %v2730_v18 = vsub.f32 %v955_v30, %v814_v12  ;;  %v728_v44 = vpop.f32.mrb[52].mxu0  ;;  %v965_v12 = vpop.permute.xlu1 %964 }
 0x15a   : > { %3595 = vst [vmem:[#allocation19_spill] sm:$0xff] %v2728_v33  ;;  %v1074_v3 = vmin.f32 %v1072_v13, %v2728_v33  ;;  %v815_v53 = vmul.f32 2.0, %v728_v44  ;;  %v730_v58 = vpop.f32.mrb[53].mxu0 }
 0x15b   : > { %3596 = vst [vmem:[#allocation20_spill] sm:$0xff] %v2730_v18  ;;  %v1111_v1 = vmin.f32 %v1109_v8, %v2730_v18  ;;  %v816_v48 = vmul.f32 2.0, %v730_v58 }
 0x15c   : > { %v2734_v56 = vsub.f32 %v960_v47, %v815_v53 }
 0x15d   : > { %v2736_v59 = vsub.f32 %v960_v47, %v816_v48  ;;  %v734_v20 = vpop.f32.mrb[54].mxu0  ;;  %v970_v48 = vpop.permute.xlu0 %969 }
 0x15e   : > { %3597 = vst [vmem:[#allocation21_spill] sm:$0xff] %v2734_v56  ;;  %v1075_v31 = vmin.f32 %v1073_v34, %v2734_v56  ;;  %v817_v23 = vmul.f32 2.0, %v734_v20  ;;  %v736_v0 = vpop.f32.mrb[55].mxu0 }
 0x15f   : > { %3598 = vst [vmem:[#allocation22_spill] sm:$0xff] %v2736_v59  ;;  %v1112_v30 = vmin.f32 %v1110_v45, %v2736_v59  ;;  %v818_v14 = vmul.f32 2.0, %v736_v0 }
 0x160   : > { %v2740_v13 = vsub.f32 %v965_v12, %v817_v23 }
 0x161   : > { %v2742_v44 = vsub.f32 %v965_v12, %v818_v14  ;;  %v740_v5 = vpop.f32.mrb[56].mxu0  ;;  %v975_v14 = vpop.permute.xlu1 %974 }
 0x162   : > { %3599 = vst [vmem:[#allocation23_spill] sm:$0xff] %v2740_v13  ;;  %v1076_v8 = vmin.f32 %v1074_v3, %v2740_v13  ;;  %v819_v53 = vmul.f32 2.0, %v740_v5  ;;  %v742_v58 = vpop.f32.mrb[57].mxu0 }
 0x163   : > { %3600 = vst [vmem:[#allocation24_spill] sm:$0xff] %v2742_v44  ;;  %v1113_v47 = vmin.f32 %v1111_v1, %v2742_v44  ;;  %v820_v18 = vmul.f32 2.0, %v742_v58 }
 0x164   : > { %v2746_v34 = vsub.f32 %v970_v48, %v819_v53 }
 0x165   : > { %v2748_v20 = vsub.f32 %v970_v48, %v820_v18  ;;  %v746_v55 = vpop.f32.mrb[58].mxu0  ;;  %v980_v18 = vpop.permute.xlu0 %979 }
 0x166   : > { %3601 = vst [vmem:[#allocation25_spill] sm:$0xff] %v2746_v34  ;;  %v1077_v45 = vmin.f32 %v1075_v31, %v2746_v34  ;;  %v821_v23 = vmul.f32 2.0, %v746_v55  ;;  %v748_v0 = vpop.f32.mrb[59].mxu0 }
 0x167   : > { %3602 = vst [vmem:[#allocation26_spill] sm:$0xff] %v2748_v20  ;;  %v1114_v12 = vmin.f32 %v1112_v30, %v2748_v20  ;;  %v822_v59 = vmul.f32 2.0, %v748_v0 }
 0x168   : > { %v2752_v3 = vsub.f32 %v975_v14, %v821_v23 }
 0x169   : > { %v2754_v5 = vsub.f32 %v975_v14, %v822_v59  ;;  %v752_v38 = vpop.f32.mrb[60].mxu0  ;;  %v985_v59 = vpop.permute.xlu1 %984 }
 0x16a   : > { %3603 = vst [vmem:[#allocation27_spill] sm:$0xff] %v2752_v3  ;;  %v1078_v1 = vmin.f32 %v1076_v8, %v2752_v3  ;;  %v823_v53 = vmul.f32 2.0, %v752_v38  ;;  %v754_v58 = vpop.f32.mrb[61].mxu0 }
 0x16b   : > { %3604 = vst [vmem:[#allocation28_spill] sm:$0xff] %v2754_v5  ;;  %v1115_v48 = vmin.f32 %v1113_v47, %v2754_v5  ;;  %v824_v44 = vmul.f32 2.0, %v754_v58 }
 0x16c   : > { %v2758_v31 = vsub.f32 %v980_v18, %v823_v53 }
 0x16d   : > { %v2760_v55 = vsub.f32 %v980_v18, %v824_v44  ;;  %v758_v22 = vpop.f32.mrb[62].mxu0  ;;  %v3555_v18 = vlaneseq }
 0x16e   : > { %3605 = vst [vmem:[#allocation29_spill] sm:$0xff] %v2758_v31  ;;  %v1079_v30 = vmin.f32 %v1077_v45, %v2758_v31  ;;  %v825_v23 = vmul.f32 2.0, %v758_v22  ;;  %v760_v0 = vpop.f32.mrb[63].mxu0 }
 0x16f   : > { %3606 = vst [vmem:[#allocation30_spill] sm:$0xff] %v2760_v55  ;;  %v1116_v14 = vmin.f32 %v1114_v12, %v2760_v55  ;;  %v826_v20 = vmul.f32 2.0, %v760_v0  ;;  %v2771_v63 = vshrl.u32 %v3555_v18, 7 }
 0x170   : > { %v2764_v8 = vsub.f32 %v985_v59, %v825_v23 }
 0x171   : > { %v2766_v38 = vsub.f32 %v985_v59, %v826_v20  ;;  %v2774_v20 = vadd.s32 8, %v2771_v63  ;;  %v2789_v59 = vadd.s32 48, %v2771_v63  ;;  %v2885_v18 = vadd.s32 128, %v2771_v63 }
 0x172   : > { %3607 = vst [vmem:[#allocation31_spill] sm:$0xff] %v2764_v8  ;;  %v1080_v47 = vmin.f32 %v1078_v1, %v2764_v8  ;;  %v2777_v1 = vadd.s32 16, %v2771_v63  ;;  %v2894_v8 = vadd.s32 152, %v2771_v63 }
 0x173   : > { %3608 = vst [vmem:[#allocation32_spill] sm:$0xff] %v2766_v38  ;;  %v1117_v53 = vmin.f32 %v1115_v48, %v2766_v38  ;;  %v3088_v38 = vadd.s32 208, %v2771_v63 }
 0x174   : > { %v1081_v58 = vmin.f32 %v1079_v30, %v1080_v47  ;;  %v2780_v30 = vadd.s32 24, %v2771_v63  ;;  %v2795_v47 = vadd.s32 64, %v2771_v63  ;;  %3609 = vst [vmem:[#allocation33_spill] sm:$0xff] %v2894_v8 }
 0x175   : > { %v1118_v44 = vmin.f32 %v1116_v14, %v1117_v53  ;;  %v2792_v14 = vadd.s32 56, %v2771_v63  ;;  %v2798_v53 = vadd.s32 72, %v2771_v63 }
 0x176   : > { %v1082_v5 = vrot.slane %v1081_v58, 4 }
 0x177   : > { %v1119_v11 = vrot.slane %v1118_v44, 4 }
 0x178   : > { %v1083_v45 = vmin.f32 %v1081_v58, %v1082_v5  ;;  %v2783_v5 = vadd.s32 32, %v2771_v63 }
 0x179   : > { %v1120_v22 = vmin.f32 %v1118_v44, %v1119_v11  ;;  %v2786_v11 = vadd.s32 40, %v2771_v63  ;;  %v2803_v44 = vadd.s32 80, %v2771_v63 }
 0x17a   : > { %v1084_v12 = vrot.slane %v1083_v45, 2 }
 0x17b   : > { %v1121_v0 = vrot.slane %v1120_v22, 2 }
 0x17c   : > { %v1085_v23 = vmin.f32 %v1083_v45, %v1084_v12  ;;  %v2806_v45 = vadd.s32 88, %v2771_v63 }
 0x17d   : > { %v1122_v55 = vmin.f32 %v1120_v22, %v1121_v0  ;;  %v2809_v22 = vadd.s32 96, %v2771_v63  ;;  %v2876_v0 = vadd.s32 104, %v2771_v63 }
 0x17e   : > { %v1086_v48 = vrot.slane %v1085_v23, 1 }
 0x17f   : > { %v1123_v12 = vrot.slane %v1122_v55, 1 }
 0x180   : > { %v2800_v58 = vmin.f32 %v1085_v23, %v1086_v48  ;;  %v2879_v23 = vadd.s32 112, %v2771_v63  ;;  %v2882_v48 = vadd.s32 120, %v2771_v63 }
 0x181   : > { %v2908_v17 = vmin.f32 %v1122_v55, %v1123_v12  ;;  %v3624_v12 = vld [vmem:[#allocation3_spill] sm:$0xff] }
 0x182   : > { %vm1158_vm1 = vcmp.eq.f32.partialorder %v2578_v27, %v2800_v58  ;;  %vm1160_vm2 = vcmp.eq.f32.partialorder %v2590_v40, %v2800_v58  ;;  %vm1162_vm3 = vcmp.eq.f32.partialorder %v2580_v28, %v2800_v58  ;;  %vm1164_vm4 = vcmp.eq.f32.partialorder %v2592_v41, %v2800_v58 }
 0x183   : > { %vm1166_vm5 = vcmp.eq.f32.partialorder %v2602_v51, %v2800_v58  ;;  %vm1168_vm6 = vcmp.eq.f32.partialorder %v2608_v60, %v2800_v58  ;;  %vm1170_vm7 = vcmp.eq.f32.partialorder %v2614_v6, %v2800_v58  ;;  %vm1172_vm8 = vcmp.eq.f32.partialorder %v2620_v15, %v2800_v58 }
 0x184   : > { %vm1174_vm9 = vcmp.eq.f32.partialorder %v2626_v24, %v2800_v58  ;;  %vm1208_vm12 = vcmp.eq.f32.partialorder %v2728_v33, %v2800_v58  ;;  %vm1210_vm13 = vcmp.eq.f32.partialorder %v2734_v56, %v2800_v58  ;;  %vm1212_vm14 = vcmp.eq.f32.partialorder %v2740_v13, %v2800_v58 }
 0x185   : > { %vm1214_vm15 = vcmp.eq.f32.partialorder %v2746_v34, %v2800_v58  ;;  %vm1216_vm0 = vcmp.eq.f32.partialorder %v2752_v3, %v2800_v58  ;;  %vm1218_vm10 = vcmp.eq.f32.partialorder %v2758_v31, %v2800_v58  ;;  %v2888_v3 = vadd.s32 136, %v2771_v63 }
 0x186   : > { %v2891_v31 = vadd.s32 144, %v2771_v63  ;;  %v2897_v34 = vadd.s32 160, %v2771_v63  ;;  %v2900_v13 = vadd.s32 168, %v2771_v63  ;;  %v2903_v56 = vadd.s32 176, %v2771_v63 }
 0x187   : > { %v2906_v33 = vadd.s32 184, %v2771_v63  ;;  %v1222_v2 = vsel %vm1158_vm1, %v2771_v63, 256  ;;  %v1224_v46 = vsel %vm1160_vm2, %v2774_v20, 256  ;;  %v1228_v55 = vsel %vm1164_vm4, %v2780_v30, 256 }
 0x188   : > { %3610 = vst [vmem:[#allocation34_spill] sm:$0xff] %v2903_v56  ;;  %v1226_v56 = vsel %vm1162_vm3, %v2777_v1, 256  ;;  %v1230_v27 = vsel %vm1166_vm5, %v2783_v5, 256  ;;  %v1232_v40 = vsel %vm1168_vm6, %v2786_v11, 256  ;;  %v1234_v28 = vsel %vm1170_vm7, %v2789_v59, 256 }
 0x189   : > { %3611 = vst [vmem:[#allocation35_spill] sm:$0xff] %v2906_v33  ;;  %v1236_v41 = vsel %vm1172_vm8, %v2792_v14, 256  ;;  %v1238_v51 = vsel %vm1174_vm9, %v2795_v47, 256  ;;  %vm3612_vm1 = vcmp.eq.f32.partialorder %v2632_v36, %v2800_v58  ;;  %vm3613_vm2 = vcmp.eq.f32.partialorder %v2638_v49, %v2800_v58 }
 0x18a   : > { %v1240_v60 = vsel %vm3612_vm1, %v2798_v53, 256  ;;  %v1242_v6 = vsel %vm3613_vm2, %v2803_v44, 256  ;;  %vm3614_vm3 = vcmp.eq.f32.partialorder %v2644_v62, %v2800_v58  ;;  %vm3615_vm4 = vcmp.eq.f32.partialorder %v2650_v10, %v2800_v58 }
 0x18b   : > { %v1244_v15 = vsel %vm3614_vm3, %v2806_v45, 256  ;;  %v1246_v24 = vsel %vm3615_vm4, %v2809_v22, 256  ;;  %vm3616_vm5 = vcmp.eq.f32.partialorder %v2656_v21, %v2800_v58  ;;  %vm3617_vm6 = vcmp.eq.f32.partialorder %v2662_v35, %v2800_v58 }
 0x18c   : > { %v1248_v36 = vsel %vm3616_vm5, %v2876_v0, 256  ;;  %v1250_v49 = vsel %vm3617_vm6, %v2879_v23, 256  ;;  %vm3618_vm7 = vcmp.eq.f32.partialorder %v2668_v54, %v2800_v58  ;;  %vm3619_vm8 = vcmp.eq.f32.partialorder %v2674_v4, %v2800_v58 }
 0x18d   : > { %v1252_v62 = vsel %vm3618_vm7, %v2882_v48, 256  ;;  %v2978_v10 = vsel %vm3619_vm8, %v2885_v18, 256  ;;  %vm3620_vm9 = vcmp.eq.f32.partialorder %v2680_v19, %v2800_v58  ;;  %vm3621_vm1 = vcmp.eq.f32.partialorder %v2686_v39, %v2800_v58 }
 0x18e   : > { %v2984_v21 = vsel %vm3620_vm9, %v2888_v3, 256  ;;  %v2990_v35 = vsel %vm3621_vm1, %v2891_v31, 256  ;;  %vm3622_vm2 = vcmp.eq.f32.partialorder %v2692_v57, %v2800_v58  ;;  %vm1286_vm3 = vcmp.lt.s32.totalorder %v1222_v2, %v1226_v56 }
 0x18f   : > { %v2996_v54 = vsel %vm3622_vm2, %v2894_v8, 256  ;;  %vm1288_vm4 = vcmp.lt.s32.totalorder %v1224_v46, %v1228_v55  ;;  %v1287_v4 = vsel %vm1286_vm3, %v1222_v2, %v1226_v56  ;;  %v3623_v56 = vld [vmem:[#allocation2_spill] sm:$0xff] }
 0x190   : > { %v1289_v19 = vsel %vm1288_vm4, %v1224_v46, %v1228_v55  ;;  %vm1290_vm9 = vcmp.lt.s32.totalorder %v1287_v4, %v1230_v27  ;;  %v3625_v55 = vld [vmem:[#allocation4_spill] sm:$0xff] }
 0x191   : > { %vm1292_vm1 = vcmp.lt.s32.totalorder %v1289_v19, %v1232_v40  ;;  %v1291_v39 = vsel %vm1290_vm9, %v1287_v4, %v1230_v27  ;;  %v3626_v4 = vld [vmem:[#allocation5_spill] sm:$0xff]  ;;  %3647 = vst [vmem:[#allocation4_spill] sm:$0xff] %v3088_v38 }
 0x192   : > { %v1293_v57 = vsel %vm1292_vm1, %v1289_v19, %v1232_v40  ;;  %vm1294_vm7 = vcmp.lt.s32.totalorder %v1291_v39, %v1234_v28  ;;  %v3629_v19 = vld [vmem:[#allocation8_spill] sm:$0xff] }
 0x193   : > { %vm1296_vm6 = vcmp.lt.s32.totalorder %v1293_v57, %v1236_v41  ;;  %v1295_v46 = vsel %vm1294_vm7, %v1291_v39, %v1234_v28  ;;  %v3627_v28 = vld [vmem:[#allocation6_spill] sm:$0xff] }
 0x194   : > { %v1297_v2 = vsel %vm1296_vm6, %v1293_v57, %v1236_v41  ;;  %vm1298_vm3 = vcmp.lt.s32.totalorder %v1295_v46, %v1238_v51  ;;  %v3628_v41 = vld [vmem:[#allocation7_spill] sm:$0xff] }
 0x195   : > { %vm1300_vm11 = vcmp.lt.s32.totalorder %v1297_v2, %v1240_v60  ;;  %v1299_v27 = vsel %vm1298_vm3, %v1295_v46, %v1238_v51  ;;  %vm1191_vm1 = vcmp.eq.f32.partialorder %v3628_v41, %v2908_v17  ;;  %v3637_v46 = vld [vmem:[#allocation20_spill] sm:$0xff] }
 0x196   : > { %v1301_v40 = vsel %vm1300_vm11, %v1297_v2, %v1240_v60  ;;  %vm1302_vm9 = vcmp.lt.s32.totalorder %v1299_v27, %v1242_v6  ;;  %v370_v2 = vld [vmem:[%s3510_s2 + $0x8] sm:$0xff]  ;;  %vm1209_vm4 = vcmp.eq.f32.partialorder %v3637_v46, %v2908_v17 }
 0x197   : > { %vm1304_vm5 = vcmp.lt.s32.totalorder %v1301_v40, %v1244_v15  ;;  %v1303_v39 = vsel %vm1302_vm9, %v1299_v27, %v1242_v6  ;;  %v3634_v27 = vld [vmem:[#allocation14_spill] sm:$0xff]  ;;  %1704 = vmatprep.mubr.f32.mxu1 %v370_v2 }
 0x198   : > { %v1305_v57 = vsel %vm1304_vm5, %v1301_v40, %v1244_v15  ;;  %vm1306_vm7 = vcmp.lt.s32.totalorder %v1303_v39, %v1246_v24 }
 0x199   : > { %vm1308_vm2 = vcmp.lt.s32.totalorder %v1305_v57, %v1248_v36  ;;  %v1307_v6 = vsel %vm1306_vm7, %v1303_v39, %v1246_v24  ;;  %v3638_v24 = vld [vmem:[#allocation22_spill] sm:$0xff] }
 0x19a   : > { %v1309_v15 = vsel %vm1308_vm2, %v1305_v57, %v1248_v36  ;;  %vm1310_vm11 = vcmp.lt.s32.totalorder %v1307_v6, %v1250_v49  ;;  %vm1211_vm2 = vcmp.eq.f32.partialorder %v3638_v24, %v2908_v17  ;;  %v3648_v57 = vld [vmem:[#allocation34_spill] sm:$0xff]  ;;  %v3105_v36 = vadd.s32 232, %v2771_v63  ;;  %v3653_v24 = vld [vmem:[#allocation17_spill] sm:$0xff] }
 0x19b   : > { %vm1312_vm3 = vcmp.lt.s32.totalorder %v1309_v15, %v1252_v62  ;;  %v1311_v51 = vsel %vm1310_vm11, %v1307_v6, %v1250_v49  ;;  %v3070_v6 = vadd.s32 192, %v2771_v63  ;;  %vm3654_vm7 = vcmp.eq.f32.partialorder %v3653_v24, %v2800_v58 }
 0x19c   : > { %v1313_v8 = vsel %vm1312_vm3, %v1309_v15, %v1252_v62  ;;  %vm1314_vm5 = vcmp.lt.s32.totalorder %v1311_v51, %v2978_v10  ;;  %v3073_v15 = vadd.s32 200, %v2771_v63  ;;  %v3091_v62 = vadd.s32 216, %v2771_v63 }
 0x19d   : > { %vm1316_vm9 = vcmp.lt.s32.totalorder %v1313_v8, %v2984_v21  ;;  %v1315_v2 = vsel %vm1314_vm5, %v1311_v51, %v2978_v10  ;;  %3643 = vst [vmem:[#allocation2_spill] sm:$0xff] %v3070_v6  ;;  %vm3645_vm5 = vcmp.eq.f32.partialorder %v2698_v9, %v2800_v58  ;;  %v3649_v9 = vld [vmem:[#allocation13_spill] sm:$0xff]  ;;  %v1274_v24 = vsel %vm1210_vm13, %v3088_v38, 256 }
 0x19e   : > { %v1317_v49 = vsel %vm1316_vm9, %v1313_v8, %v2984_v21  ;;  %3644 = vst [vmem:[#allocation3_spill] sm:$0xff] %v3073_v15  ;;  %vm1318_vm8 = vcmp.lt.s32.totalorder %v1315_v2, %v2990_v35  ;;  %v1262_v8 = vsel %vm3645_vm5, %v2897_v34, 256  ;;  %vm3646_vm9 = vcmp.eq.f32.partialorder %v2704_v26, %v2800_v58  ;;  %v3651_v26 = vld [vmem:[#allocation15_spill] sm:$0xff] }
 0x19f   : > { %vm1320_vm6 = vcmp.lt.s32.totalorder %v1317_v49, %v2996_v54  ;;  %v1264_v10 = vsel %vm3646_vm9, %v2900_v13, 256  ;;  %v1319_v21 = vsel %vm1318_vm8, %v1315_v2, %v2990_v35  ;;  %vm3650_vm5 = vcmp.eq.f32.partialorder %v3649_v9, %v2800_v58 }
 0x1a0   : > { %v1321_v51 = vsel %vm1320_vm6, %v1317_v49, %v2996_v54  ;;  %vm1322_vm11 = vcmp.lt.s32.totalorder %v1319_v21, %v1262_v8  ;;  %v1266_v39 = vsel %vm3650_vm5, %v3648_v57, 256  ;;  %vm3652_vm9 = vcmp.eq.f32.partialorder %v3651_v26, %v2800_v58 }
 0x1a1   : > { %vm1324_vm3 = vcmp.lt.s32.totalorder %v1321_v51, %v1264_v10  ;;  %v1268_v35 = vsel %vm3652_vm9, %v2906_v33, 256  ;;  %v1323_v2 = vsel %vm1322_vm11, %v1319_v21, %v1262_v8  ;;  %v3102_v49 = vadd.s32 224, %v2771_v63 }
 0x1a2   : > { %v1325_v54 = vsel %vm1324_vm3, %v1321_v51, %v1264_v10  ;;  %vm1326_vm8 = vcmp.lt.s32.totalorder %v1323_v2, %v1266_v39  ;;  %v1270_v9 = vsel %vm3654_vm7, %v3070_v6, 256  ;;  %v1272_v26 = vsel %vm1208_vm12, %v3073_v15, 256 }
 0x1a3   : > { %vm1328_vm6 = vcmp.lt.s32.totalorder %v1325_v54, %v1268_v35  ;;  %v1327_v8 = vsel %vm1326_vm8, %v1323_v2, %v1266_v39  ;;  %v3116_v21 = vadd.s32 240, %v2771_v63  ;;  %v3119_v51 = vadd.s32 248, %v2771_v63 }
 0x1a4   : > { %v1329_v10 = vsel %vm1328_vm6, %v1325_v54, %v1268_v35  ;;  %vm1330_vm3 = vcmp.lt.s32.totalorder %v1327_v8, %v1270_v9  ;;  %v1276_v46 = vsel %vm1212_vm14, %v3091_v62, 256  ;;  %v1278_v54 = vsel %vm1214_vm15, %v3102_v49, 256 }
 0x1a5   : > { %vm1332_vm11 = vcmp.lt.s32.totalorder %v1329_v10, %v1272_v26  ;;  %v1331_v39 = vsel %vm1330_vm3, %v1327_v8, %v1270_v9  ;;  %v1280_v60 = vsel %vm1216_vm0, %v3105_v36, 256  ;;  %v1282_v6 = vsel %vm1218_vm10, %v3116_v21, 256  ;;  %v3661_v9 = vld [vmem:[#allocation31_spill] sm:$0xff] }
 0x1a6   : > { %v1333_v35 = vsel %vm1332_vm11, %v1329_v10, %v1272_v26  ;;  %vm1334_vm12 = vcmp.lt.s32.totalorder %v1331_v39, %v1274_v24  ;;  %vm3662_vm13 = vcmp.eq.f32.partialorder %v3661_v9, %v2800_v58  ;;  %vm3663_vm15 = vcmp.eq.f32.partialorder %v2582_v29, %v2908_v17 }
 0x1a7   : > { %vm1336_vm7 = vcmp.lt.s32.totalorder %v1333_v35, %v1276_v46  ;;  %v1335_v38 = vsel %vm1334_vm12, %v1331_v39, %v1274_v24  ;;  %v1284_v26 = vsel %vm3662_vm13, %v3119_v51, 256  ;;  %v1223_v15 = vsel %vm3663_vm15, %v2771_v63, 256 }
 0x1a8   : > { %v1337_v40 = vsel %vm1336_vm7, %v1333_v35, %v1276_v46  ;;  %vm1338_vm14 = vcmp.lt.s32.totalorder %v1335_v38, %v1278_v54  ;;  %vm3664_vm0 = vcmp.eq.f32.partialorder %v2594_v42, %v2908_v17  ;;  %vm3665_vm8 = vcmp.eq.f32.partialorder %v2584_v32, %v2908_v17 }
 0x1a9   : > { %vm1340_vm5 = vcmp.lt.s32.totalorder %v1337_v40, %v1280_v60  ;;  %v1339_v8 = vsel %vm1338_vm14, %v1335_v38, %v1278_v54  ;;  %v1225_v33 = vsel %vm3664_vm0, %v2774_v20, 256  ;;  %v1227_v58 = vsel %vm3665_vm8, %v2777_v1, 256 }
 0x1aa   : > { %v1341_v10 = vsel %vm1340_vm5, %v1337_v40, %v1280_v60  ;;  %vm1342_vm10 = vcmp.lt.s32.totalorder %v1339_v8, %v1282_v6  ;;  %vm3666_vm6 = vcmp.eq.f32.partialorder %v2596_v43, %v2908_v17  ;;  %vm3667_vm11 = vcmp.eq.f32.partialorder %v2604_v52, %v2908_v17 }
 0x1ab   : > { %vm1344_vm9 = vcmp.lt.s32.totalorder %v1341_v10, %v1284_v26  ;;  %v1229_v38 = vsel %vm3666_vm6, %v2780_v30, 256  ;;  %v1343_v40 = vsel %vm1342_vm10, %v1339_v8, %v1282_v6  ;;  %v1231_v42 = vsel %vm3667_vm11, %v2783_v5, 256 }
 0x1ac   : > { %v1345_v29 = vsel %vm1344_vm9, %v1341_v10, %v1284_v26  ;;  %vm1357_vm12 = vcmp.lt.s32.totalorder %v1223_v15, %v1227_v58  ;;  %vm1359_vm7 = vcmp.lt.s32.totalorder %v1225_v33, %v1229_v38  ;;  %vm3668_vm13 = vcmp.eq.f32.partialorder %v2610_v61, %v2908_v17 }
 0x1ad   : > { %vm1346_vm3 = vcmp.lt.s32.totalorder %v1343_v40, %v1345_v29  ;;  %v1233_v32 = vsel %vm3668_vm13, %v2786_v11, 256  ;;  %v1358_v39 = vsel %vm1357_vm12, %v1223_v15, %v1227_v58  ;;  %v1360_v43 = vsel %vm1359_vm7, %v1225_v33, %v1229_v38 }
 0x1ae   : > { %v1347_v24 = vsel %vm1346_vm3, %v1343_v40, %v1345_v29  ;;  %vm3669_vm14 = vcmp.eq.f32.partialorder %v2616_v7, %v2908_v17  ;;  %vm1361_vm5 = vcmp.lt.s32.totalorder %v1358_v39, %v1231_v42  ;;  %vm1363_vm15 = vcmp.lt.s32.totalorder %v1360_v43, %v1233_v32 }
 0x1af   : > { %v1348_v46 = vrot.slane %v1347_v24, 4  ;;  %v1235_v35 = vsel %vm3669_vm14, %v2789_v59, 256  ;;  %vm3670_vm10 = vcmp.eq.f32.partialorder %v2622_v16, %v2908_v17  ;;  %v1362_v2 = vsel %vm1361_vm5, %v1358_v39, %v1231_v42  ;;  %v3683_v39 = vld [vmem:[#allocation10_spill] sm:$0xff] }
 0x1b0   : > { %v1237_v52 = vsel %vm3670_vm10, %v2792_v14, 256  ;;  %v1364_v54 = vsel %vm1363_vm15, %v1360_v43, %v1233_v32  ;;  %vm3671_vm9 = vcmp.eq.f32.partialorder %v2628_v25, %v2908_v17  ;;  %vm1365_vm8 = vcmp.lt.s32.totalorder %v1362_v2, %v1235_v35  ;;  %v3682_v32 = vld [vmem:[#allocation33_spill] sm:$0xff] }
 0x1b1   : > { %vm1349_vm0 = vcmp.lt.s32.totalorder %v1347_v24, %v1348_v46  ;;  %v1239_v61 = vsel %vm3671_vm9, %v2795_v47, 256  ;;  %vm1367_vm6 = vcmp.lt.s32.totalorder %v1364_v54, %v1237_v52  ;;  %vm3672_vm3 = vcmp.eq.f32.partialorder %v2634_v37, %v2908_v17 }
 0x1b2   : > { %v1350_v60 = vsel %vm1349_vm0, %v1347_v24, %v1348_v46  ;;  %v1241_v6 = vsel %vm3672_vm3, %v2798_v53, 256  ;;  %v1366_v9 = vsel %vm1365_vm8, %v1362_v2, %v1235_v35  ;;  %v1368_v26 = vsel %vm1367_vm6, %v1364_v54, %v1237_v52  ;;  %v3680_v46 = vld [vmem:[#allocation9_spill] sm:$0xff]  ;;  %v3687_v2 = vld [vmem:[#allocation12_spill] sm:$0xff] }
 0x1b3   : > { %v1351_v7 = vrot.slane %v1350_v60, 2  ;;  %vm3673_vm11 = vcmp.eq.f32.partialorder %v2640_v50, %v2908_v17  ;;  %vm1369_vm12 = vcmp.lt.s32.totalorder %v1366_v9, %v1239_v61  ;;  %vm1371_vm7 = vcmp.lt.s32.totalorder %v1368_v26, %v1241_v6 }
 0x1b4   : > { %v1243_v16 = vsel %vm3673_vm11, %v2803_v44, 256  ;;  %vm3674_vm14 = vcmp.eq.f32.partialorder %v3623_v56, %v2908_v17  ;;  %v1370_v8 = vsel %vm1369_vm12, %v1366_v9, %v1239_v61  ;;  %v1372_v10 = vsel %vm1371_vm7, %v1368_v26, %v1241_v6  ;;  %v3690_v9 = vld [vmem:[#allocation35_spill] sm:$0xff]  ;;  %v3691_v26 = vld [vmem:[#allocation16_spill] sm:$0xff] }
 0x1b5   : > { %vm1352_vm13 = vcmp.lt.s32.totalorder %v1350_v60, %v1351_v7  ;;  %v1245_v25 = vsel %vm3674_vm14, %v2806_v45, 256  ;;  %vm1373_vm5 = vcmp.lt.s32.totalorder %v1370_v8, %v1243_v16  ;;  %vm3675_vm0 = vcmp.eq.f32.partialorder %v3624_v12, %v2908_v17 }
 0x1b6   : > { %v1353_v15 = vsel %vm1352_vm13, %v1350_v60, %v1351_v7  ;;  %vm1375_vm15 = vcmp.lt.s32.totalorder %v1372_v10, %v1245_v25  ;;  %v1247_v37 = vsel %vm3675_vm0, %v2809_v22, 256  ;;  %vm3676_vm10 = vcmp.eq.f32.partialorder %v3625_v55, %v2908_v17 }
 0x1b7   : > { %v1249_v50 = vsel %vm3676_vm10, %v2876_v0, 256  ;;  %v1374_v33 = vsel %vm1373_vm5, %v1370_v8, %v1243_v16  ;;  %v1376_v58 = vsel %vm1375_vm15, %v1372_v10, %v1245_v25  ;;  %vm3677_vm9 = vcmp.eq.f32.partialorder %v3626_v4, %v2908_v17  ;;  %v3693_v10 = vld [vmem:[#allocation2_spill] sm:$0xff] }
 0x1b8   : > { %v1251_v56 = vsel %vm3677_vm9, %v2879_v23, 256  ;;  %vm1377_vm8 = vcmp.lt.s32.totalorder %v1374_v33, %v1247_v37  ;;  %vm1379_vm6 = vcmp.lt.s32.totalorder %v1376_v58, %v1249_v50  ;;  %v1354_v38 = vrot.slane %v1353_v15, 1 }
 0x1b9   : > { %vm3678_vm3 = vcmp.eq.f32.partialorder %v3627_v28, %v2908_v17  ;;  %v1378_v40 = vsel %vm1377_vm8, %v1374_v33, %v1247_v37  ;;  %v1380_v29 = vsel %vm1379_vm6, %v1376_v58, %v1249_v50  ;;  %v1255_v55 = vsel %vm1191_vm1, %v2885_v18, 256  ;;  %v3694_v37 = vld [vmem:[#allocation18_spill] sm:$0xff]  ;;  %v3696_v50 = vld [vmem:[#allocation3_spill] sm:$0xff] }
 0x1ba   : > { %v1253_v12 = vsel %vm3678_vm3, %v2882_v48, 256  ;;  %vm1381_vm11 = vcmp.lt.s32.totalorder %v1378_v40, %v1251_v56  ;;  %vm3679_vm7 = vcmp.eq.f32.partialorder %v3629_v19, %v2908_v17  ;;  %vm3681_vm13 = vcmp.eq.f32.partialorder %v3680_v46, %v2908_v17  ;;  %v3685_v19 = vld [vmem:[#allocation11_spill] sm:$0xff]  ;;  %v3704_v46 = vld [vmem:[#allocation26_spill] sm:$0xff] }
 0x1bb   : > { %vm1383_vm12 = vcmp.lt.s32.totalorder %v1380_v29, %v1253_v12  ;;  %v1257_v4 = vsel %vm3679_vm7, %v2888_v3, 256  ;;  %v1382_v24 = vsel %vm1381_vm11, %v1378_v40, %v1251_v56  ;;  %v1259_v28 = vsel %vm3681_vm13, %v2891_v31, 256 }
 0x1bc   : > { %v1384_v42 = vsel %vm1383_vm12, %v1380_v29, %v1253_v12  ;;  %vm1385_vm14 = vcmp.lt.s32.totalorder %v1382_v24, %v1255_v55  ;;  %vm1355_vm15 = vcmp.lt.s32.totalorder %v1353_v15, %v1354_v38  ;;  %vm3684_vm0 = vcmp.eq.f32.partialorder %v3683_v39, %v2908_v17  ;;  %v3700_v12 = vld [vmem:[#allocation4_spill] sm:$0xff] }
 0x1bd   : > { %vm1387_vm5 = vcmp.lt.s32.totalorder %v1384_v42, %v1257_v4  ;;  %v1261_v41 = vsel %vm3684_vm0, %v3682_v32, 256  ;;  %v1386_v43 = vsel %vm1385_vm14, %v1382_v24, %v1255_v55  ;;  %vm3686_vm9 = vcmp.eq.f32.partialorder %v3685_v19, %v2908_v17  ;;  %v3702_v55 = vld [vmem:[#allocation24_spill] sm:$0xff]  ;;  %v3708_v19 = vld [vmem:[#allocation30_spill] sm:$0xff] }
 0x1be   : > { %v1388_v35 = vsel %vm1387_vm5, %v1384_v42, %v1257_v4  ;;  %vm1389_vm1 = vcmp.lt.s32.totalorder %v1386_v43, %v1259_v28  ;;  %v1263_v52 = vsel %vm3686_vm9, %v2897_v34, 256  ;;  %vm3688_vm8 = vcmp.eq.f32.partialorder %v3687_v2, %v2908_v17  ;;  %v3706_v39 = vld [vmem:[#allocation28_spill] sm:$0xff] }
 0x1bf   : > { %vm1391_vm10 = vcmp.lt.s32.totalorder %v1388_v35, %v1261_v41  ;;  %v1265_v54 = vsel %vm3688_vm8, %v2900_v13, 256  ;;  %v1390_v60 = vsel %vm1389_vm1, %v1386_v43, %v1259_v28  ;;  %v3233_v7 = vsel %vm1355_vm15, %v1353_v15, %v1354_v38  ;;  %v3710_v2 = vld [vmem:[#allocation32_spill] sm:$0xff] }
 0x1c0   : > { %v1392_v61 = vsel %vm1391_vm10, %v1388_v35, %v1261_v41  ;;  %vm1393_vm6 = vcmp.lt.s32.totalorder %v1390_v60, %v1263_v52  ;;  %vm3689_vm11 = vcmp.eq.f32.partialorder %v3634_v27, %v2908_v17  ;;  %vm3692_vm12 = vcmp.eq.f32.partialorder %v3691_v26, %v2908_v17 }
 0x1c1   : > { %vm1395_vm3 = vcmp.lt.s32.totalorder %v1392_v61, %v1265_v54  ;;  %v1267_v6 = vsel %vm3689_vm11, %v3648_v57, 256  ;;  %v1269_v16 = vsel %vm3692_vm12, %v3690_v9, 256  ;;  %v1394_v25 = vsel %vm1393_vm6, %v1390_v60, %v1263_v52 }
 0x1c2   : > { %v1396_v8 = vsel %vm1395_vm3, %v1392_v61, %v1265_v54  ;;  %vm3695_vm7 = vcmp.eq.f32.partialorder %v3694_v37, %v2908_v17  ;;  %v1273_v58 = vsel %vm1209_vm4, %v3696_v50, 256  ;;  %vm1397_vm13 = vcmp.lt.s32.totalorder %v1394_v25, %v1267_v6 }
 0x1c3   : > { %v1271_v15 = vsel %vm3695_vm7, %v3693_v10, 256  ;;  %vm1399_vm14 = vcmp.lt.s32.totalorder %v1396_v8, %v1269_v16  ;;  %v1398_v27 = vsel %vm1397_vm13, %v1394_v25, %v1267_v6  ;;  %vm1480_vm5 = vcmp.eq.s32.totalorder %v2885_v18, %v3233_v7 }
 0x1c4   : > { %v1400_v56 = vsel %vm1399_vm14, %v1396_v8, %v1269_v16  ;;  %vm1482_vm15 = vcmp.eq.s32.totalorder %v2888_v3, %v3233_v7  ;;  %vm1401_vm0 = vcmp.lt.s32.totalorder %v1398_v27, %v1271_v15  ;;  %v1275_v29 = vsel %vm1211_vm2, %v3700_v12, 256 }
 0x1c5   : > { %vm1403_vm1 = vcmp.lt.s32.totalorder %v1400_v56, %v1273_v58  ;;  %vm3255_vm10 = vmpackc.low %vm1482_vm15, %vm1480_vm5  ;;  %vm3703_vm4 = vcmp.eq.f32.partialorder %v3702_v55, %v2908_v17  ;;  %v1402_v24 = vsel %vm1401_vm0, %v1398_v27, %v1271_v15  ;;  %vm3705_vm6 = vcmp.eq.f32.partialorder %v3704_v46, %v2908_v17 }
 0x1c6   : > { %v1277_v4 = vsel %vm3703_vm4, %v3091_v62, 256  ;;  %v1404_v42 = vsel %vm1403_vm1, %v1400_v56, %v1273_v58  ;;  %vm1405_vm9 = vcmp.lt.s32.totalorder %v1402_v24, %v1275_v29  ;;  %v1279_v28 = vsel %vm3705_vm6, %v3102_v49, 256 }
 0x1c7   : > { %vm1407_vm8 = vcmp.lt.s32.totalorder %v1404_v42, %v1277_v4  ;;  %vm3707_vm3 = vcmp.eq.f32.partialorder %v3706_v39, %v2908_v17  ;;  %v1406_v43 = vsel %vm1405_vm9, %v1402_v24, %v1275_v29  ;;  %vm3709_vm12 = vcmp.eq.f32.partialorder %v3708_v19, %v2908_v17  ;;  %v2221_v39 = vld [vmem:[%s2313_s28 + $0x30] sm:$0xff] }
 0x1c8   : > { %v1281_v41 = vsel %vm3707_vm3, %v3105_v36, 256  ;;  %v1408_v35 = vsel %vm1407_vm8, %v1404_v42, %v1277_v4  ;;  %vm1409_vm2 = vcmp.lt.s32.totalorder %v1406_v43, %v1279_v28  ;;  %v1283_v52 = vsel %vm3709_vm12, %v3116_v21, 256 }
 0x1c9   : > { %vm1411_vm11 = vcmp.lt.s32.totalorder %v1408_v35, %v1281_v41  ;;  %vm3711_vm7 = vcmp.eq.f32.partialorder %v3710_v2, %v2908_v17  ;;  %v1410_v60 = vsel %vm1409_vm2, %v1406_v43, %v1279_v28  ;;  %v2249_v8 = vmov 1966171168  }
 0x1ca   : > { %v1285_v54 = vsel %vm3711_vm7, %v3119_v51, 256  ;;  %v1412_v61 = vsel %vm1411_vm11, %v1408_v35, %v1281_v41  ;;  %vm1413_vm13 = vcmp.lt.s32.totalorder %v1410_v60, %v1283_v52  ;;  %v1430_v37 = vunpack.c.l.s4 %v2249_v8  ;;  %v2222_v35 = vld [vmem:[%s2313_s28 + $0x38] sm:$0xff] }
 0x1cb   : > { %vm1415_vm14 = vcmp.lt.s32.totalorder %v1412_v61, %v1285_v54  ;;  %v1414_v6 = vsel %vm1413_vm13, %v1410_v60, %v1283_v52  ;;  %vm1448_vm4 = vcmp.eq.s32.totalorder %v2771_v63, %v3233_v7  ;;  %vm1450_vm9 = vcmp.eq.s32.totalorder %v2774_v20, %v3233_v7 }
 0x1cc   : > { %v1416_v26 = vsel %vm1415_vm14, %v1412_v61, %v1285_v54  ;;  %v1431_v58 = vunpack.c.0.s8 %v1430_v37  ;;  %v2250_v4 = vmov 1.0|1.0   ;;  %vm2121_vm12 = vmpackc.low %vm1450_vm9, %vm1448_vm4  ;;  %vm1452_vm14 = vcmp.eq.s32.totalorder %v2777_v1, %v3233_v7 }
 0x1cd   : > { %vm1417_vm5 = vcmp.lt.s32.totalorder %v1414_v6, %v1416_v26  ;;  %vm1456_vm9 = vcmp.eq.s32.totalorder %v2783_v5, %v3233_v7 }
 0x1ce   : > { %v1418_v16 = vsel %vm1417_vm5, %v1414_v6, %v1416_v26  ;;  %v1434_v56 = vsub.s32 %v1431_v58, %v2771_v63  ;;  %vm1454_vm5 = vcmp.eq.s32.totalorder %v2780_v30, %v3233_v7 }
 0x1cf   : > { %v1419_v25 = vrot.slane %v1418_v16, 4 }
 0x1d1   : > { %vm1420_vm15 = vcmp.lt.s32.totalorder %v1418_v16, %v1419_v25 }
 0x1d2   : > { %v1421_v15 = vsel %vm1420_vm15, %v1418_v16, %v1419_v25 }
 0x1d3   : > { %v1422_v33 = vrot.slane %v1421_v15, 2 }
 0x1d5   : > { %vm1423_vm0 = vcmp.lt.s32.totalorder %v1421_v15, %v1422_v33 }
 0x1d6   : > { %v1424_v27 = vsel %vm1423_vm0, %v1421_v15, %v1422_v33 }
 0x1d7   : > { %v1425_v17 = vrot.slane %v1424_v27, 1 }
 0x1d9   : > { %vm1426_vm1 = vcmp.lt.s32.totalorder %v1424_v27, %v1425_v17 }
 0x1da   : > { %v3284_v40 = vsel %vm1426_vm1, %v1424_v27, %v1425_v17  ;;  %vm2125_vm1 = vmpackc.low %vm1454_vm5, %vm1452_vm14 }
 0x1db   : > { %v1428_v29 = vcombine.low %v3233_v7, %v3284_v40  ;;  %vm1449_vm8 = vcmp.eq.s32.totalorder %v2771_v63, %v3284_v40  ;;  %vm1451_vm6 = vcmp.eq.s32.totalorder %v2774_v20, %v3284_v40  ;;  %vm1453_vm3 = vcmp.eq.s32.totalorder %v2777_v1, %v3284_v40  ;;  %v376_v1 = vld [vmem:[%s3510_s2 + $0x38] sm:$0xff] }
 0x1dc   : > { %vm2119_vm2 = vmpackc.low %vm1451_vm6, %vm1449_vm8  ;;  %vm1455_vm11 = vcmp.eq.s32.totalorder %v2780_v30, %v3284_v40  ;;  %v3712_v63 = vlaneseq  ;;  %vm1457_vm15 = vcmp.eq.s32.totalorder %v2783_v5, %v3284_v40  ;;  %vm1459_vm0 = vcmp.eq.s32.totalorder %v2786_v11, %v3284_v40  ;;  %v375_v30 = vld [vmem:[%s3510_s2 + $0x30] sm:$0xff] }
 0x1dd   : > { %v1435_v55 = vrot.slane %v1428_v29, %v1434_v56  ;;  %2120 = vmatprep.subr.msk.bf16.mxu1 %vm2119_vm2, %v2250_v4  ;;  %vm2123_vm13 = vmpackc.low %vm1455_vm11, %vm1453_vm3  ;;  %vm1458_vm8 = vcmp.eq.s32.totalorder %v2786_v11, %v3233_v7  ;;  %vm1461_vm6 = vcmp.eq.s32.totalorder %v2789_v59, %v3284_v40  ;;  %vm1463_vm3 = vcmp.eq.s32.totalorder %v2792_v14, %v3284_v40  ;;  %v2215_v11 = vld [vmem:[%s2313_s28] sm:$0xff] }
 0x1de   : > { %vm1445_vm7 = vcmp.lt.s32.totalorder %v3712_v63, 256  ;;  %2122 = vmatpush1.bf16.msk.msra.mxu1 %vm2121_vm12, %v2250_v4  ;;  %vm2127_vm4 = vmpackc.low %vm1459_vm0, %vm1457_vm15  ;;  %vm1460_vm12 = vcmp.eq.s32.totalorder %v2789_v59, %v3233_v7  ;;  %vm1467_vm14 = vcmp.eq.s32.totalorder %v2798_v53, %v3284_v40  ;;  %vm1464_vm0 = vcmp.eq.s32.totalorder %v2795_v47, %v3233_v7 }
 0x1df   : > { %v1442_v20 = vrot.slane %v1435_v55, %v1434_v56  ;;  %2124 = vmatprep.subr.msk.bf16.mxu1 %vm2123_vm13, %v2250_v4  ;;  %vm2129_vm2 = vmpackc.low %vm1458_vm8, %vm1456_vm9  ;;  %vm1465_vm13 = vcmp.eq.s32.totalorder %v2795_v47, %v3284_v40  ;;  %vm1471_vm9 = vcmp.eq.s32.totalorder %v2806_v45, %v3284_v40  ;;  %v2216_v47 = vld [vmem:[%s2313_s28 + $0x8] sm:$0xff] }
 0x1e0   : > { %vm2131_vm11 = vmpackc.low %vm1463_vm3, %vm1461_vm6  ;;  %vm1468_vm3 = vcmp.eq.s32.totalorder %v2803_v44, %v3233_v7 }
 0x1e1   : > { %1447 = vst.msk [vmem:[%s321_s12] sm:$0x3] %vm1445_vm7, %v1442_v20  ;;  %vm1462_vm7 = vcmp.eq.s32.totalorder %v2792_v14, %v3233_v7  ;;  %vm2135_vm15 = vmpackc.low %vm1467_vm14, %vm1465_vm13  ;;  %vm1472_vm14 = vcmp.eq.s32.totalorder %v2809_v22, %v3233_v7 }
 0x1e2   : > { %2126 = vmatpush1.bf16.msk.msra.mxu1 %vm2125_vm1, %v2250_v4  ;;  %vm2133_vm5 = vmpackc.low %vm1462_vm7, %vm1460_vm12  ;;  %vm1466_vm1 = vcmp.eq.s32.totalorder %v2798_v53, %v3233_v7  ;;  %vm1475_vm12 = vcmp.eq.s32.totalorder %v2876_v0, %v3284_v40 }
 0x1e3   : > { %2128 = vmatprep.subr.msk.bf16.mxu1 %vm2127_vm4, %v2250_v4  ;;  %vm1469_vm4 = vcmp.eq.s32.totalorder %v2803_v44, %v3284_v40  ;;  %vm2137_vm8 = vmpackc.low %vm1466_vm1, %vm1464_vm0  ;;  %vm1479_vm0 = vcmp.eq.s32.totalorder %v2882_v48, %v3284_v40 }
 0x1e4   : > { %vm2139_vm6 = vmpackc.low %vm1471_vm9, %vm1469_vm4  ;;  %vm1476_vm9 = vcmp.eq.s32.totalorder %v2879_v23, %v3233_v7 }
 0x1e6   : > { %2130 = vmatpush1.bf16.msk.msra.mxu1 %vm2129_vm2, %v2250_v4  ;;  %vm1470_vm2 = vcmp.eq.s32.totalorder %v2806_v45, %v3233_v7 }
 0x1e7   : > { %2132 = vmatprep.subr.msk.bf16.mxu1 %vm2131_vm11, %v2250_v4  ;;  %vm1473_vm11 = vcmp.eq.s32.totalorder %v2809_v22, %v3284_v40  ;;  %vm2141_vm7 = vmpackc.low %vm1470_vm2, %vm1468_vm3  ;;  %vm1483_vm3 = vcmp.eq.s32.totalorder %v2888_v3, %v3284_v40  ;;  %v371_v3 = vld [vmem:[%s3510_s2 + $0x10] sm:$0xff] }
 0x1e8   : > { %vm2143_vm13 = vmpackc.low %vm1475_vm12, %vm1473_vm11  ;;  %vm1485_vm12 = vcmp.eq.s32.totalorder %v2891_v31, %v3284_v40 }
 0x1ea   : > { %2134 = vmatpush1.bf16.msk.msra.mxu1 %vm2133_vm5, %v2250_v4  ;;  %vm1474_vm5 = vcmp.eq.s32.totalorder %v2876_v0, %v3233_v7  ;;  %v2217_v0 = vld [vmem:[%s2313_s28 + $0x10] sm:$0xff] }
 0x1eb   : > { %2136 = vmatprep.subr.msk.bf16.mxu1 %vm2135_vm15, %v2250_v4  ;;  %vm1477_vm15 = vcmp.eq.s32.totalorder %v2879_v23, %v3284_v40  ;;  %vm2145_vm1 = vmpackc.low %vm1474_vm5, %vm1472_vm14  ;;  %vm1484_vm14 = vcmp.eq.s32.totalorder %v2891_v31, %v3233_v7  ;;  %vm1486_vm5 = vcmp.eq.s32.totalorder %v3682_v32, %v3233_v7  ;;  %v374_v31 = vld [vmem:[%s3510_s2 + $0x28] sm:$0xff] }
 0x1ec   : > { %vm2147_vm4 = vmpackc.low %vm1479_vm0, %vm1477_vm15  ;;  %vm1489_vm15 = vcmp.eq.s32.totalorder %v2897_v34, %v3284_v40  ;;  %vm1491_vm0 = vcmp.eq.s32.totalorder %v2900_v13, %v3284_v40 }
 0x1ee   : > { %2138 = vmatpush1.bf16.msk.msra.mxu1 %vm2137_vm8, %v2250_v4  ;;  %vm1478_vm8 = vcmp.eq.s32.totalorder %v2882_v48, %v3233_v7 }
 0x1ef   : > { %2140 = vmatprep.subr.msk.bf16.mxu1 %vm2139_vm6, %v2250_v4  ;;  %vm1481_vm6 = vcmp.eq.s32.totalorder %v2885_v18, %v3284_v40  ;;  %vm2149_vm2 = vmpackc.low %vm1478_vm8, %vm1476_vm9  ;;  %vm1490_vm9 = vcmp.eq.s32.totalorder %v2900_v13, %v3233_v7  ;;  %vm1493_vm8 = vcmp.eq.s32.totalorder %v3648_v57, %v3284_v40  ;;  %v369_v13 = vld [vmem:[%s3510_s2] sm:$0xff] }
 0x1f0   : > { %vm2151_vm11 = vmpackc.low %vm1483_vm3, %vm1481_vm6  ;;  %vm1495_vm6 = vcmp.eq.s32.totalorder %v3690_v9, %v3284_v40  ;;  %v373_v18 = vld [vmem:[%s3510_s2 + $0x20] sm:$0xff] }
 0x1f2   : > { %2142 = vmatpush1.bf16.msk.msra.mxu1 %vm2141_vm7, %v2250_v4  ;;  %vm1487_vm7 = vcmp.eq.s32.totalorder %v3682_v32, %v3284_v40 }
 0x1f3   : > { %2144 = vmatprep.subr.msk.bf16.mxu1 %vm2143_vm13, %v2250_v4  ;;  %vm2155_vm13 = vmpackc.low %vm1487_vm7, %vm1485_vm12  ;;  %vm1494_vm12 = vcmp.eq.s32.totalorder %v3690_v9, %v3233_v7  ;;  %vm1497_vm7 = vcmp.eq.s32.totalorder %v3693_v10, %v3284_v40 }
 0x1f6   : > { %2146 = vmatpush1.bf16.msk.msra.mxu1 %vm2145_vm1, %v2250_v4  ;;  %vm2157_vm1 = vmpackc.low %vm1486_vm5, %vm1484_vm14 }
 0x1f7   : > { %2148 = vmatprep.subr.msk.bf16.mxu1 %vm2147_vm4, %v2250_v4  ;;  %vm2159_vm4 = vmpackc.low %vm1491_vm0, %vm1489_vm15  ;;  %vm1496_vm15 = vcmp.eq.s32.totalorder %v3693_v10, %v3233_v7  ;;  %vm1498_vm0 = vcmp.eq.s32.totalorder %v3696_v50, %v3233_v7 }
 0x1fa   : > { %2150 = vmatpush1.bf16.msk.msra.mxu1 %vm2149_vm2, %v2250_v4  ;;  %vm2163_vm2 = vmpackc.low %vm1495_vm6, %vm1493_vm8  ;;  %vm1500_vm8 = vcmp.eq.s32.totalorder %v3700_v12, %v3233_v7  ;;  %vm1502_vm6 = vcmp.eq.s32.totalorder %v3091_v62, %v3233_v7 }
 0x1fb   : > { %2152 = vmatprep.subr.msk.bf16.mxu1 %vm2151_vm11, %v2250_v4  ;;  %vm1492_vm11 = vcmp.eq.s32.totalorder %v3648_v57, %v3233_v7  ;;  %v2218_v57 = vld [vmem:[%s2313_s28 + $0x18] sm:$0xff] }
 0x1fc   : > { %vm2165_vm14 = vmpackc.low %vm1494_vm12, %vm1492_vm11 }
 0x1fd   : > { %vm2173_vm11 = vmpackc.low %vm1502_vm6, %vm1500_vm8 }
 0x1fe   : > { %2154 = vmatpush1.bf16.msk.msra.mxu1 %vm3255_vm10, %v2250_v4  ;;  %vm1488_vm10 = vcmp.eq.s32.totalorder %v2897_v34, %v3233_v7  ;;  %v372_v34 = vld [vmem:[%s3510_s2 + $0x18] sm:$0xff] }
 0x1ff   : > { %2156 = vmatprep.subr.msk.bf16.mxu1 %vm2155_vm13, %v2250_v4  ;;  %vm2161_vm3 = vmpackc.low %vm1490_vm9, %vm1488_vm10  ;;  %vm1499_vm13 = vcmp.eq.s32.totalorder %v3696_v50, %v3284_v40  ;;  %v2220_v50 = vld [vmem:[%s2313_s28 + $0x28] sm:$0xff] }
 0x200   : > { %vm2167_vm5 = vmpackc.low %vm1499_vm13, %vm1497_vm7  ;;  %vm1504_vm7 = vcmp.eq.s32.totalorder %v3102_v49, %v3233_v7  ;;  %vm1506_vm13 = vcmp.eq.s32.totalorder %v3105_v36, %v3233_v7 }
 0x201   : > { %vm2169_vm10 = vmpackc.low %vm1498_vm0, %vm1496_vm15 }
 0x202   : > { %2158 = vmatpush1.bf16.msk.msra.mxu1 %vm2157_vm1, %v2250_v4  ;;  %vm1501_vm1 = vcmp.eq.s32.totalorder %v3700_v12, %v3284_v40  ;;  %vm2177_vm15 = vmpackc.low %vm1506_vm13, %vm1504_vm7 }
 0x203   : > { %2160 = vmatprep.subr.msk.bf16.mxu1 %vm2159_vm4, %v2250_v4  ;;  %vm1503_vm4 = vcmp.eq.s32.totalorder %v3091_v62, %v3284_v40 }
 0x204   : > { %vm2171_vm9 = vmpackc.low %vm1503_vm4, %vm1501_vm1  ;;  %vm1508_vm1 = vcmp.eq.s32.totalorder %v3116_v21, %v3233_v7  ;;  %vm1510_vm4 = vcmp.eq.s32.totalorder %v3119_v51, %v3233_v7  ;;  %v2219_v7 = vld [vmem:[%s2313_s28 + $0x20] sm:$0xff]  ;;  %s328_s28 = scalar_lea.vmem %s3514_s6, %s3718_s21 }
 0x206   : > { %2162 = vmatpush1.bf16.msk.msra.mxu1 %vm2161_vm3, %v2250_v4  ;;  %vm1505_vm3 = vcmp.eq.s32.totalorder %v3102_v49, %v3284_v40 }
 0x207   : > { %2164 = vmatprep.subr.msk.bf16.mxu1 %vm2163_vm2, %v2250_v4  ;;  %vm1507_vm2 = vcmp.eq.s32.totalorder %v3105_v36, %v3284_v40 }
 0x208   : > { %vm2175_vm12 = vmpackc.low %vm1507_vm2, %vm1505_vm3 }
 0x20a   : > { %2166 = vmatpush1.bf16.msk.msra.mxu1 %vm2165_vm14, %v2250_v4  ;;  %vm1509_vm14 = vcmp.eq.s32.totalorder %v3116_v21, %v3284_v40 }
 0x20b   : > { %2168 = vmatprep.subr.msk.bf16.mxu1 %vm2167_vm5, %v2250_v4  ;;  %vm1511_vm5 = vcmp.eq.s32.totalorder %v3119_v51, %v3284_v40 }
 0x20c   : > { %vm2179_vm0 = vmpackc.low %vm1511_vm5, %vm1509_vm14 }
 0x20e   : > { %2170 = vmatpush1.bf16.msk.msra.mxu1 %vm2169_vm10, %v2250_v4  ;;  %vm2181_vm10 = vmpackc.low %vm1510_vm4, %vm1508_vm1 }
 0x20f   : > { %2172 = vmatprep.subr.msk.bf16.mxu1 %vm2171_vm9, %v2250_v4 }
 0x212   : > { %2174 = vmatpush1.bf16.msk.msra.mxu1 %vm2173_vm11, %v2250_v4 }
 0x213   : > { %2176 = vmatprep.subr.msk.bf16.mxu1 %vm2175_vm12, %v2250_v4 }
 0x216   : > { %2178 = vmatpush1.bf16.msk.msra.mxu1 %vm2177_vm15, %v2250_v4 }
 0x217   : > { %2180 = vmatprep.subr.msk.bf16.mxu1 %vm2179_vm0, %v2250_v4 }
 0x21a   : > { %2182 = vmatpush1.bf16.msk.msra.mxu1 %vm2181_vm10, %v2250_v4 }
 0x21d   : > { %1705 = vmatmul.mubr.f32.vlgmr.msra.gmra.mrb[0].mxu1 %v369_v13 }
 0x21e   : > { %1710 = vmatprep.mubr.f32.mxu1 %v372_v34 }
 0x221   : > { %1711 = vmatmul.mubr.f32.gmra.mrb[2].mxu1 %v371_v3 }
 0x222   : > { %1716 = vmatprep.mubr.f32.mxu1 %v374_v31 }
 0x225   : > { %1717 = vmatmul.mubr.f32.gmra.mrb[4].mxu1 %v373_v18 }
 0x226   : > { %1722 = vmatprep.mubr.f32.mxu1 %v376_v1 }
 0x229   : > { %1723 = vmatmul.mubr.f32.gmra.mrb[6].mxu1 %v375_v30 }
 0x2f0   : > { %v1706_v5 = vpop.f32.mrb[0].mxu1 }
 0x2f1   : > { %1729 = vst [vmem:[%s3477_s11] sm:$0xff] %v1706_v5  ;;  %v1737_v59 = vsub.f32 %v2215_v11, %v1706_v5  ;;  %v1708_v14 = vpop.f32.mrb[1].mxu1 }
 0x2f2   : > { %1730 = vst [vmem:[%s3477_s11 + $0x8] sm:$0xff] %v1708_v14  ;;  %v1738_v53 = vsub.f32 %v2216_v47, %v1708_v14 }
 0x2f3   : > { %v1745_v44 = vmul.f32 %v1737_v59, %v1737_v59 }
 0x2f4   : > { %v1746_v45 = vmul.f32 %v1738_v53, %v1738_v53  ;;  %v1712_v22 = vpop.f32.mrb[2].mxu1 }
 0x2f5   : > { %1731 = vst [vmem:[%s3477_s11 + $0x10] sm:$0xff] %v1712_v22  ;;  %v1739_v23 = vsub.f32 %v2217_v0, %v1712_v22  ;;  %v1714_v48 = vpop.f32.mrb[3].mxu1 }
 0x2f6   : > { %v1753_v36 = vadd.f32 %v1746_v45, %v1745_v44  ;;  %1732 = vst [vmem:[%s3477_s11 + $0x18] sm:$0xff] %v1714_v48  ;;  %v1740_v62 = vsub.f32 %v2218_v57, %v1714_v48 }
 0x2f7   : > { %v1747_v49 = vmul.f32 %v1739_v23, %v1739_v23 }
 0x2f8   : > { %v1748_v21 = vmul.f32 %v1740_v62, %v1740_v62  ;;  %v1718_v51 = vpop.f32.mrb[4].mxu1 }
 0x2f9   : > { %v1754_v32 = vadd.f32 %v1753_v36, %v1747_v49  ;;  %1733 = vst [vmem:[%s3477_s11 + $0x20] sm:$0xff] %v1718_v51  ;;  %v1741_v9 = vsub.f32 %v2219_v7, %v1718_v51  ;;  %v1720_v10 = vpop.f32.mrb[5].mxu1 }
 0x2fa   : > { %1734 = vst [vmem:[%s3477_s11 + $0x28] sm:$0xff] %v1720_v10  ;;  %v1742_v38 = vsub.f32 %v2220_v50, %v1720_v10 }
 0x2fb   : > { %v1755_v12 = vadd.f32 %v1754_v32, %v1748_v21  ;;  %v1749_v24 = vmul.f32 %v1741_v9, %v1741_v9 }
 0x2fc   : > { %v1750_v42 = vmul.f32 %v1742_v38, %v1742_v38  ;;  %v1724_v46 = vpop.f32.mrb[6].mxu1 }
 0x2fd   : > { %v1756_v28 = vadd.f32 %v1755_v12, %v1749_v24  ;;  %1735 = vst [vmem:[%s3477_s11 + $0x30] sm:$0xff] %v1724_v46  ;;  %v1743_v41 = vsub.f32 %v2221_v39, %v1724_v46  ;;  %v1726_v43 = vpop.f32.mrb[7].mxu1 }
 0x2fe   : > { %1736 = vst [vmem:[%s3477_s11 + $0x38] sm:$0xff] %v1726_v43  ;;  %v1744_v19 = vsub.f32 %v2222_v35, %v1726_v43 }
 0x2ff   : > { %v1757_v52 = vadd.f32 %v1756_v28, %v1750_v42  ;;  %v1751_v2 = vmul.f32 %v1743_v41, %v1743_v41 }
 0x300   : > { %v1752_v54 = vmul.f32 %v1744_v19, %v1744_v19 }
 0x301   : > { %v1758_v60 = vadd.f32 %v1757_v52, %v1751_v2 }
 0x303   : > { %v1759_v61 = vadd.f32 %v1758_v60, %v1752_v54 }
 0x305   : > { %1760 = vadd.xlane.f32.xlu0 %v1759_v61 }
 0x392   : > { %v1761_v6 = vpop.xlane.xlu0 %1760 }
 0x393   : > { %v1762_v26 = vrot.slane %v1761_v6, 4 }
 0x395   : > { %v1763_v16 = vadd.f32 %v1762_v26, %v1761_v6 }
 0x397   : > { %v1764_v25 = vrot.slane %v1763_v16, 2 }
 0x399   : > { %v1765_v8 = vadd.f32 %v1764_v25, %v1763_v16 }
 0x39b   : > { %v1766_v37 = vrot.slane %v1765_v8, 1 }
 0x39d   : > { %v1767_v15 = vadd.f32 %v1766_v37, %v1765_v8 }
 0x39f   : > { %2183 = vpush %v1767_v15 }
 0x3d0   : > { %s2184_s13 = spop %2183 }
 0x3d1   : > { %v1769_v33 = vstv %s2184_s13 }
 0x3d2   : > { %1770 = vst [vmem:[%s328_s28] sm:$0x1] %v1769_v33 }
 0x3d3 PF: > { %s17_s23 = sadd.s32 1, %s2245_s23   ;;  %s3713_s21 = smov %s2241_s22 }
 0x3d4   : > { %p14_p5 = scmp.ge.s32.totalorder %s17_s23, 4   ;;  %s3714_s22 = smov %s3716_s24 }
 0x3d6   :  { %16 = sbr.rel (!%p14_p5) target bundleno = 2 (0x2), region = 90 }

</bundles_post_ra>
